<compile_context>
chip_gen: v6e
topology: v6e:2x2x1
jax: 0.10.0
libtpu: 0.0.40
codegen_flags: <defaults>
</compile_context>

<pallas_src>
import math

import jax
import jax.numpy as jnp
from jax.experimental import pallas as pl
from jax.experimental.pallas import tpu as pltpu

IN_FEATURES = 4096
OUT_FEATURES = 10
# ~85% of HBM roofline at a 512-row f32 tile; x double-buffer = 16 MiB (fits v7x).
_DEFAULT_BATCH_TILE = 512


def linear_logsoftmax_kernel(x_ref, w_ref, b_ref, o_ref):
    # Linear: MXU matmul over K=4096 with f32 accumulation, then bias broadcast.
    z = jnp.dot(x_ref[...], w_ref[...], preferred_element_type=jnp.float32)
    z = z + b_ref[...]                                   # (TB, 10) + (1, 10)
    # Numerically stable log-softmax along dim=1 (row-wise).
    m = jnp.max(z, axis=-1, keepdims=True)               # (TB, 1)
    lse = jnp.log(jnp.sum(jnp.exp(z - m), axis=-1, keepdims=True)) + m
    o_ref[...] = (z - lse).astype(o_ref.dtype)


def derived_model3_forward(x, w, b, *, batch_tile=_DEFAULT_BATCH_TILE):
    """x: [B, 4096] f32, w: [4096, 10] f32, b: [1, 10] f32 -> [B, 10] f32."""
    B = x.shape[0]
    # If B fits in one tile, use the full extent (always legal w.r.t. (8,128)
    # rule since it equals the array dim); otherwise 512 (multiple of 8),
    # ragged last tile handled by cdiv grid + Pallas block padding (log-softmax
    # is per-row, so padded rows are harmless and their writes are masked).
    tb = B if B <= batch_tile else batch_tile
    grid = (pl.cdiv(B, tb),)

    cost = pl.CostEstimate(
        flops=2 * B * IN_FEATURES * OUT_FEATURES,
        transcendentals=2 * B * OUT_FEATURES,            # exp + log per row*col
        bytes_accessed=(B * IN_FEATURES * 4
                        + IN_FEATURES * OUT_FEATURES * 4
                        + B * OUT_FEATURES * 4),
    )

    return pl.pallas_call(
        linear_logsoftmax_kernel,
        out_shape=jax.ShapeDtypeStruct((B, OUT_FEATURES), jnp.float32),
        grid_spec=pltpu.PrefetchScalarGridSpec(
            num_scalar_prefetch=0,
            grid=grid,
            in_specs=[
                pl.BlockSpec((tb, IN_FEATURES), lambda i: (i, 0)),
                pl.BlockSpec((IN_FEATURES, OUT_FEATURES), lambda i: (0, 0)),
                pl.BlockSpec((1, OUT_FEATURES), lambda i: (0, 0)),
            ],
            out_specs=pl.BlockSpec((tb, OUT_FEATURES), lambda i: (i, 0)),
        ),
        compiler_params=pltpu.CompilerParams(
            dimension_semantics=("parallel",),           # rows independent -> v7x megacore
            vmem_limit_bytes=32 * 1024 * 1024,           # covers 512-row f32 tile on all gens
        ),
        cost_estimate=cost,
    )(x, w, b)


def init_params(key):
    # Mimic torch.nn.Linear default init: U(-1/sqrt(fan_in), 1/sqrt(fan_in)).
    kw, kb = jax.random.split(key)
    bound = 1.0 / math.sqrt(IN_FEATURES)
    w = jax.random.uniform(
        kw, (IN_FEATURES, OUT_FEATURES), jnp.float32, minval=-bound, maxval=bound
    )
    b = jax.random.uniform(
        kb, (1, OUT_FEATURES), jnp.float32, minval=-bound, maxval=bound
    )
    return w, b


if __name__ == "__main__":
    key = jax.random.PRNGKey(0)
    kx, kx2, kp = jax.random.split(key, 3)
    w, b = init_params(kp)

    # Small single-tile check (B = 8).
    B = 8
    x = jax.random.normal(kx, (B, IN_FEATURES), jnp.float32)
    out = jax.block_until_ready(derived_model3_forward(x, w, b))
    ref = jax.nn.log_softmax(x @ w + b, axis=1)
    assert out.shape == (B, OUT_FEATURES)
    assert jnp.allclose(out, ref, atol=1e-5, rtol=1e-5)

    # Multi-tile pipelined path with a ragged last tile, still at small shapes:
    # B=40, tile=16 -> grid of 3 steps, last step 8 valid rows.
    B2 = 40
    x2 = jax.random.normal(kx2, (B2, IN_FEATURES), jnp.float32)
    out2 = jax.block_until_ready(derived_model3_forward(x2, w, b, batch_tile=16))
    ref2 = jax.nn.log_softmax(x2 @ w + b, axis=1)
    assert out2.shape == (B2, OUT_FEATURES)
    assert jnp.allclose(out2, ref2, atol=1e-5, rtol=1e-5)

    print("KERNEL_OK")
</pallas_src>

<mosaic_0001>
module attributes {stable_mosaic.version = 11 : i64} {
  func.func @linear_logsoftmax_kernel(%arg0: i32, %arg1: memref<8x4096xf32, #tpu.memory_space<vmem>>, %arg2: memref<4096x10xf32, #tpu.memory_space<vmem>>, %arg3: memref<1x10xf32, #tpu.memory_space<vmem>>, %arg4: memref<8x10xf32, #tpu.memory_space<vmem>>) attributes {dimension_semantics = [#tpu.dimension_semantics<parallel>], iteration_bounds = array<i64: 1>, scalar_prefetch = 0 : i64, scratch_operands = 0 : i64, tpu.core_type = #tpu.core_type<tc>, window_params = [{transform_indices = @transform_0, window_bounds = array<i64: 8, 4096>}, {pipeline_mode = #tpu.pipeline_mode<synchronous>, transform_indices = @transform_1, window_bounds = array<i64: 4096, 10>}, {pipeline_mode = #tpu.pipeline_mode<synchronous>, transform_indices = @transform_2, window_bounds = array<i64: 1, 10>}, {transform_indices = @transform_3, window_bounds = array<i64: 8, 10>}]} {
    %c0 = arith.constant 0 : index
    %c0_0 = arith.constant 0 : index
    %0 = vector.load %arg1[%c0, %c0_0] : memref<8x4096xf32, #tpu.memory_space<vmem>>, vector<8x4096xf32>
    %c0_1 = arith.constant 0 : index
    %c0_2 = arith.constant 0 : index
    %1 = vector.load %arg2[%c0_1, %c0_2] : memref<4096x10xf32, #tpu.memory_space<vmem>>, vector<4096x10xf32>
    %cst = arith.constant dense<0.000000e+00> : vector<8x10xf32>
    %2 = tpu.matmul %0, %1, %cst {dimension_numbers = #tpu.dot_dimension_numbers<[1], [0], [0], [1], [0, 0, 1, 1], [], []>} : vector<8x4096xf32>, vector<4096x10xf32>, vector<8x10xf32> -> vector<8x10xf32>
    %c0_3 = arith.constant 0 : index
    %c0_4 = arith.constant 0 : index
    %3 = vector.load %arg3[%c0_3, %c0_4] : memref<1x10xf32, #tpu.memory_space<vmem>>, vector<1x10xf32>
    %4 = vector.broadcast %3 : vector<1x10xf32> to vector<8x10xf32>
    %5 = arith.addf %2, %4 : vector<8x10xf32>
    %cst_5 = arith.constant dense<0xFF800000> : vector<8xf32>
    %6 = vector.multi_reduction <maximumf>, %5, %cst_5 [1] : vector<8x10xf32> to vector<8xf32>
    %7 = vector.shape_cast %6 : vector<8xf32> to vector<8x1xf32>
    %8 = vector.broadcast %7 : vector<8x1xf32> to vector<8x10xf32>
    %9 = arith.subf %5, %8 : vector<8x10xf32>
    %10 = math.exp %9 : vector<8x10xf32>
    %cst_6 = arith.constant dense<0.000000e+00> : vector<8xf32>
    %11 = vector.multi_reduction <add>, %10, %cst_6 [1] : vector<8x10xf32> to vector<8xf32>
    %12 = vector.shape_cast %11 : vector<8xf32> to vector<8x1xf32>
    %13 = math.log %12 : vector<8x1xf32>
    %14 = arith.addf %13, %7 : vector<8x1xf32>
    %15 = vector.broadcast %14 : vector<8x1xf32> to vector<8x10xf32>
    %16 = arith.subf %5, %15 : vector<8x10xf32>
    %c0_7 = arith.constant 0 : index
    %c0_8 = arith.constant 0 : index
    %17 = vector.load %arg4[%c0_7, %c0_8] : memref<8x10xf32, #tpu.memory_space<vmem>>, vector<8x10xf32>
    tpu.vector_store %arg4[%c0_7, %c0_8], %16 {strides = array<i32>} : memref<8x10xf32, #tpu.memory_space<vmem>>, vector<8x10xf32>,
    return
  }
  func.func @transform_0(%arg0: i32) -> (i32, i32) {
    %c0_i32 = arith.constant 0 : i32
    %c0_i32_0 = arith.constant 0 : i32
    return %arg0, %c0_i32 : i32, i32
  }
  func.func @transform_1(%arg0: i32) -> (i32, i32) {
    %c0_i32 = arith.constant 0 : i32
    %c0_i32_0 = arith.constant 0 : i32
    %c0_i32_1 = arith.constant 0 : i32
    return %c0_i32, %c0_i32_0 : i32, i32
  }
  func.func @transform_2(%arg0: i32) -> (i32, i32) {
    %c0_i32 = arith.constant 0 : i32
    %c0_i32_0 = arith.constant 0 : i32
    %c0_i32_1 = arith.constant 0 : i32
    return %c0_i32, %c0_i32_0 : i32, i32
  }
  func.func @transform_3(%arg0: i32) -> (i32, i32) {
    %c0_i32 = arith.constant 0 : i32
    %c0_i32_0 = arith.constant 0 : i32
    return %arg0, %c0_i32 : i32, i32
  }
}

</mosaic_0001>

<bundles_post_ra>
// kernel: tpu_custom_call.1
= control target key start
LH: loop header
LB: loop body
LE: loop exit
PB: predicated region body
PF: predicated region fallthrough
CT: control target
= control target key end

     0   :  { %s3965_s0 = inlined_call_operand.vmem [shape: f32[8,4096], index: 0, kind: input, shape index: {}]   ;;  %s3966_s1 = inlined_call_operand.vmem [shape: f32[4096,10], index: 1, kind: input, shape index: {}]   ;;  %s3967_s2 = inlined_call_operand.vmem [shape: f32[1,10], index: 2, kind: input, shape index: {}]   ;;  %s3968_s3 = inlined_call_operand.hbm [shape: f32[8,10], index: 3, kind: output, shape index: {}]  }
   0x1   :  { %v78_v0 = vld [vmem:[%s3966_s1 + $0xf8] sm:$0xff]  ;;  %v77_v4 = vld [vmem:[%s3966_s1 + $0xf0] sm:$0xff]  ;;  %v76_v8 = vld [vmem:[%s3966_s1 + $0xe8] sm:$0xff] }
   0x2   :  { %v110_v1 = vld [vmem:[%s3966_s1 + $0x1f8] sm:$0xff]  ;;  %1716 = vmatprep.subr.mxu0 %v78_v0  ;;  %v109_v5 = vld [vmem:[%s3966_s1 + $0x1f0] sm:$0xff]  ;;  %v108_v9 = vld [vmem:[%s3966_s1 + $0x1e8] sm:$0xff] }
   0x3   :  { %v62_v2 = vld [vmem:[%s3966_s1 + $0x78] sm:$0xff]  ;;  %1751 = vmatprep.subr.mxu1 %v110_v1  ;;  %v61_v6 = vld [vmem:[%s3966_s1 + $0x70] sm:$0xff]  ;;  %v60_v10 = vld [vmem:[%s3966_s1 + $0x68] sm:$0xff] }
   0x4   :  { %v94_v3 = vld [vmem:[%s3966_s1 + $0x178] sm:$0xff]  ;;  %1717 = vmatpush3.msra.mxu0 %v62_v2  ;;  %v93_v7 = vld [vmem:[%s3966_s1 + $0x170] sm:$0xff]  ;;  %v92_v11 = vld [vmem:[%s3966_s1 + $0x168] sm:$0xff] }
   0x5   :  { %1752 = vmatpush3.msra.mxu1 %v94_v3  ;;  %1718 = vmatprep.subr.mxu0 %v77_v4  ;;  %v75_v12 = vld [vmem:[%s3966_s1 + $0xe0] sm:$0xff]  ;;  %v74_v16 = vld [vmem:[%s3966_s1 + $0xd8] sm:$0xff]  ;;  %v73_v20 = vld [vmem:[%s3966_s1 + $0xd0] sm:$0xff] }
   0x6   :  { %1753 = vmatprep.subr.mxu1 %v109_v5  ;;  %1719 = vmatpush3.msra.mxu0 %v61_v6  ;;  %v107_v13 = vld [vmem:[%s3966_s1 + $0x1e0] sm:$0xff]  ;;  %v106_v17 = vld [vmem:[%s3966_s1 + $0x1d8] sm:$0xff]  ;;  %v105_v21 = vld [vmem:[%s3966_s1 + $0x1d0] sm:$0xff] }
   0x7   :  { %1754 = vmatpush3.msra.mxu1 %v93_v7  ;;  %1720 = vmatprep.subr.mxu0 %v76_v8  ;;  %v59_v14 = vld [vmem:[%s3966_s1 + $0x60] sm:$0xff]  ;;  %v58_v18 = vld [vmem:[%s3966_s1 + $0x58] sm:$0xff]  ;;  %v57_v22 = vld [vmem:[%s3966_s1 + $0x50] sm:$0xff] }
   0x8   :  { %1755 = vmatprep.subr.mxu1 %v108_v9  ;;  %v91_v15 = vld [vmem:[%s3966_s1 + $0x160] sm:$0xff]  ;;  %1721 = vmatpush3.msra.mxu0 %v60_v10  ;;  %v90_v19 = vld [vmem:[%s3966_s1 + $0x158] sm:$0xff]  ;;  %v89_v23 = vld [vmem:[%s3966_s1 + $0x150] sm:$0xff] }
   0x9   :  { %1756 = vmatpush3.msra.mxu1 %v92_v11  ;;  %1722 = vmatprep.subr.mxu0 %v75_v12  ;;  %v72_v24 = vld [vmem:[%s3966_s1 + $0xc8] sm:$0xff]  ;;  %v71_v28 = vld [vmem:[%s3966_s1 + $0xc0] sm:$0xff]  ;;  %v70_v32 = vld [vmem:[%s3966_s1 + $0xb8] sm:$0xff] }
   0xa   :  { %1757 = vmatprep.subr.mxu1 %v107_v13  ;;  %1723 = vmatpush3.msra.mxu0 %v59_v14  ;;  %v104_v25 = vld [vmem:[%s3966_s1 + $0x1c8] sm:$0xff]  ;;  %v103_v29 = vld [vmem:[%s3966_s1 + $0x1c0] sm:$0xff]  ;;  %v102_v33 = vld [vmem:[%s3966_s1 + $0x1b8] sm:$0xff] }
   0xb   :  { %1758 = vmatpush3.msra.mxu1 %v91_v15  ;;  %1724 = vmatprep.subr.mxu0 %v74_v16  ;;  %v56_v26 = vld [vmem:[%s3966_s1 + $0x48] sm:$0xff]  ;;  %v55_v30 = vld [vmem:[%s3966_s1 + $0x40] sm:$0xff]  ;;  %v54_v34 = vld [vmem:[%s3966_s1 + $0x38] sm:$0xff] }
   0xc   :  { %1759 = vmatprep.subr.mxu1 %v106_v17  ;;  %1725 = vmatpush3.msra.mxu0 %v58_v18  ;;  %v88_v27 = vld [vmem:[%s3966_s1 + $0x148] sm:$0xff]  ;;  %v87_v31 = vld [vmem:[%s3966_s1 + $0x140] sm:$0xff]  ;;  %v86_v35 = vld [vmem:[%s3966_s1 + $0x138] sm:$0xff] }
   0xd   :  { %1760 = vmatpush3.msra.mxu1 %v90_v19  ;;  %1726 = vmatprep.subr.mxu0 %v73_v20  ;;  %v69_v36 = vld [vmem:[%s3966_s1 + $0xb0] sm:$0xff]  ;;  %v68_v40 = vld [vmem:[%s3966_s1 + $0xa8] sm:$0xff]  ;;  %v67_v44 = vld [vmem:[%s3966_s1 + $0xa0] sm:$0xff] }
   0xe   :  { %1761 = vmatprep.subr.mxu1 %v105_v21  ;;  %1727 = vmatpush3.msra.mxu0 %v57_v22  ;;  %v101_v37 = vld [vmem:[%s3966_s1 + $0x1b0] sm:$0xff]  ;;  %v100_v41 = vld [vmem:[%s3966_s1 + $0x1a8] sm:$0xff]  ;;  %v99_v45 = vld [vmem:[%s3966_s1 + $0x1a0] sm:$0xff] }
   0xf   :  { %1762 = vmatpush3.msra.mxu1 %v89_v23  ;;  %1728 = vmatprep.subr.mxu0 %v72_v24  ;;  %v53_v38 = vld [vmem:[%s3966_s1 + $0x30] sm:$0xff]  ;;  %v52_v42 = vld [vmem:[%s3966_s1 + $0x28] sm:$0xff]  ;;  %v51_v46 = vld [vmem:[%s3966_s1 + $0x20] sm:$0xff] }
  0x10   :  { %1763 = vmatprep.subr.mxu1 %v104_v25  ;;  %1729 = vmatpush3.msra.mxu0 %v56_v26  ;;  %v85_v39 = vld [vmem:[%s3966_s1 + $0x130] sm:$0xff]  ;;  %v84_v43 = vld [vmem:[%s3966_s1 + $0x128] sm:$0xff]  ;;  %v83_v47 = vld [vmem:[%s3966_s1 + $0x120] sm:$0xff] }
  0x11   :  { %1764 = vmatpush3.msra.mxu1 %v88_v27  ;;  %1730 = vmatprep.subr.mxu0 %v71_v28  ;;  %v66_v48 = vld [vmem:[%s3966_s1 + $0x98] sm:$0xff]  ;;  %v65_v52 = vld [vmem:[%s3966_s1 + $0x90] sm:$0xff]  ;;  %v64_v56 = vld [vmem:[%s3966_s1 + $0x88] sm:$0xff] }
  0x12   :  { %1765 = vmatprep.subr.mxu1 %v103_v29  ;;  %1731 = vmatpush3.msra.mxu0 %v55_v30  ;;  %v98_v49 = vld [vmem:[%s3966_s1 + $0x198] sm:$0xff]  ;;  %v97_v53 = vld [vmem:[%s3966_s1 + $0x190] sm:$0xff]  ;;  %v96_v57 = vld [vmem:[%s3966_s1 + $0x188] sm:$0xff] }
  0x13   :  { %1766 = vmatpush3.msra.mxu1 %v87_v31  ;;  %1732 = vmatprep.subr.mxu0 %v70_v32  ;;  %v50_v50 = vld [vmem:[%s3966_s1 + $0x18] sm:$0xff]  ;;  %v49_v54 = vld [vmem:[%s3966_s1 + $0x10] sm:$0xff]  ;;  %v48_v58 = vld [vmem:[%s3966_s1 + $0x8] sm:$0xff] }
  0x14   :  { %1767 = vmatprep.subr.mxu1 %v102_v33  ;;  %1733 = vmatpush3.msra.mxu0 %v54_v34  ;;  %v82_v51 = vld [vmem:[%s3966_s1 + $0x118] sm:$0xff]  ;;  %v81_v55 = vld [vmem:[%s3966_s1 + $0x110] sm:$0xff]  ;;  %v80_v59 = vld [vmem:[%s3966_s1 + $0x108] sm:$0xff] }
  0x15   :  { %1768 = vmatpush3.msra.mxu1 %v86_v35  ;;  %1734 = vmatprep.subr.mxu0 %v69_v36  ;;  %v63_v60 = vld [vmem:[%s3966_s1 + $0x80] sm:$0xff]  ;;  %v16_v63 = vld [vmem:[%s3965_s0 + $0x8] sm:$0xff]  ;;  %v18_v2 = vld [vmem:[%s3965_s0 + $0x18] sm:$0xff] }
  0x16   :  { %1769 = vmatprep.subr.mxu1 %v101_v37  ;;  %1735 = vmatpush3.msra.mxu0 %v53_v38  ;;  %v95_v61 = vld [vmem:[%s3966_s1 + $0x180] sm:$0xff]  ;;  %v142_v3 = vld [vmem:[%s3966_s1 + $0x2f8] sm:$0xff]  ;;  %v17_v5 = vld [vmem:[%s3965_s0 + $0x10] sm:$0xff] }
  0x17   :  { %1770 = vmatpush3.msra.mxu1 %v85_v39  ;;  %1736 = vmatprep.subr.mxu0 %v68_v40  ;;  %v47_v62 = vld [vmem:[%s3966_s1] sm:$0xff]  ;;  %v174_v4 = vld [vmem:[%s3966_s1 + $0x3f8] sm:$0xff]  ;;  %v141_v8 = vld [vmem:[%s3966_s1 + $0x2f0] sm:$0xff] }
  0x18   :  { %1771 = vmatprep.subr.mxu1 %v100_v41  ;;  %1737 = vmatpush3.msra.mxu0 %v52_v42  ;;  %v79_v0 = vld [vmem:[%s3966_s1 + $0x100] sm:$0xff]  ;;  %v126_v6 = vld [vmem:[%s3966_s1 + $0x278] sm:$0xff]  ;;  %v173_v9 = vld [vmem:[%s3966_s1 + $0x3f0] sm:$0xff] }
  0x19   :  { %1772 = vmatpush3.msra.mxu1 %v84_v43  ;;  %1738 = vmatprep.subr.mxu0 %v67_v44  ;;  %v15_v1 = vld [vmem:[%s3965_s0] sm:$0xff]  ;;  %v158_v7 = vld [vmem:[%s3966_s1 + $0x378] sm:$0xff]  ;;  %v125_v10 = vld [vmem:[%s3966_s1 + $0x270] sm:$0xff] }
  0x1a   :  { %1773 = vmatprep.subr.mxu1 %v99_v45  ;;  %1739 = vmatpush3.msra.mxu0 %v51_v46  ;;  %v157_v11 = vld [vmem:[%s3966_s1 + $0x370] sm:$0xff]  ;;  %v140_v12 = vld [vmem:[%s3966_s1 + $0x2e8] sm:$0xff]  ;;  %v139_v16 = vld [vmem:[%s3966_s1 + $0x2e0] sm:$0xff] }
  0x1b   :  { %1774 = vmatpush3.msra.mxu1 %v83_v47  ;;  %1740 = vmatprep.subr.mxu0 %v66_v48  ;;  %v172_v13 = vld [vmem:[%s3966_s1 + $0x3e8] sm:$0xff]  ;;  %v171_v17 = vld [vmem:[%s3966_s1 + $0x3e0] sm:$0xff]  ;;  %v138_v20 = vld [vmem:[%s3966_s1 + $0x2d8] sm:$0xff] }
  0x1c   :  { %1775 = vmatprep.subr.mxu1 %v98_v49  ;;  %1741 = vmatpush3.msra.mxu0 %v50_v50  ;;  %v124_v14 = vld [vmem:[%s3966_s1 + $0x268] sm:$0xff]  ;;  %v123_v18 = vld [vmem:[%s3966_s1 + $0x260] sm:$0xff]  ;;  %v170_v21 = vld [vmem:[%s3966_s1 + $0x3d8] sm:$0xff] }
  0x1d   :  { %1776 = vmatpush3.msra.mxu1 %v82_v51  ;;  %1742 = vmatprep.subr.mxu0 %v65_v52  ;;  %v156_v15 = vld [vmem:[%s3966_s1 + $0x368] sm:$0xff]  ;;  %v155_v19 = vld [vmem:[%s3966_s1 + $0x360] sm:$0xff]  ;;  %v122_v22 = vld [vmem:[%s3966_s1 + $0x258] sm:$0xff] }
  0x1e   :  { %1777 = vmatprep.subr.mxu1 %v97_v53  ;;  %1743 = vmatpush3.msra.mxu0 %v49_v54  ;;  %v154_v23 = vld [vmem:[%s3966_s1 + $0x358] sm:$0xff]  ;;  %v137_v24 = vld [vmem:[%s3966_s1 + $0x2d0] sm:$0xff]  ;;  %v136_v28 = vld [vmem:[%s3966_s1 + $0x2c8] sm:$0xff] }
  0x1f   :  { %1778 = vmatpush3.msra.mxu1 %v81_v55  ;;  %1744 = vmatprep.subr.mxu0 %v64_v56  ;;  %v169_v25 = vld [vmem:[%s3966_s1 + $0x3d0] sm:$0xff]  ;;  %v168_v29 = vld [vmem:[%s3966_s1 + $0x3c8] sm:$0xff]  ;;  %v135_v32 = vld [vmem:[%s3966_s1 + $0x2c0] sm:$0xff] }
  0x20   :  { %1779 = vmatprep.subr.mxu1 %v96_v57  ;;  %1745 = vmatpush3.msra.mxu0 %v48_v58  ;;  %v121_v26 = vld [vmem:[%s3966_s1 + $0x250] sm:$0xff]  ;;  %v120_v30 = vld [vmem:[%s3966_s1 + $0x248] sm:$0xff]  ;;  %v167_v33 = vld [vmem:[%s3966_s1 + $0x3c0] sm:$0xff] }
  0x21   :  { %1780 = vmatpush3.msra.mxu1 %v80_v59  ;;  %1746 = vmatprep.subr.mxu0 %v63_v60  ;;  %v153_v27 = vld [vmem:[%s3966_s1 + $0x350] sm:$0xff]  ;;  %v152_v31 = vld [vmem:[%s3966_s1 + $0x348] sm:$0xff]  ;;  %v119_v34 = vld [vmem:[%s3966_s1 + $0x240] sm:$0xff] }
  0x22   :  { %1781 = vmatprep.subr.mxu1 %v95_v61  ;;  %1747 = vmatpush3.msra.mxu0 %v47_v62  ;;  %v151_v35 = vld [vmem:[%s3966_s1 + $0x340] sm:$0xff]  ;;  %v134_v36 = vld [vmem:[%s3966_s1 + $0x2b8] sm:$0xff]  ;;  %v133_v40 = vld [vmem:[%s3966_s1 + $0x2b0] sm:$0xff] }
  0x23   :  { %630 = vmatprep.mubr.f32.mxu0 %v16_v63  ;;  %1782 = vmatpush3.msra.mxu1 %v79_v0  ;;  %v166_v37 = vld [vmem:[%s3966_s1 + $0x3b8] sm:$0xff]  ;;  %v165_v41 = vld [vmem:[%s3966_s1 + $0x3b0] sm:$0xff]  ;;  %v132_v44 = vld [vmem:[%s3966_s1 + $0x2a8] sm:$0xff] }
  0x24   :  { %631 = vmatmul.mubr.f32.vlgmr.msra.gmra.mxu0 %v15_v1  ;;  %700 = vmatprep.mubr.f32.mxu1 %v18_v2  ;;  %v118_v38 = vld [vmem:[%s3966_s1 + $0x238] sm:$0xff]  ;;  %v117_v42 = vld [vmem:[%s3966_s1 + $0x230] sm:$0xff]  ;;  %v164_v45 = vld [vmem:[%s3966_s1 + $0x3a8] sm:$0xff] }
  0x25   :  { %1786 = vmatprep.subr.mxu0 %v142_v3  ;;  %1821 = vmatprep.subr.mxu1 %v174_v4  ;;  %v150_v39 = vld [vmem:[%s3966_s1 + $0x338] sm:$0xff]  ;;  %v149_v43 = vld [vmem:[%s3966_s1 + $0x330] sm:$0xff]  ;;  %v116_v46 = vld [vmem:[%s3966_s1 + $0x228] sm:$0xff] }
  0x26   :  { %701 = vmatmul.mubr.f32.vlgmr.msra.gmra.mxu1 %v17_v5  ;;  %1787 = vmatpush3.msra.mxu0 %v126_v6  ;;  %v148_v47 = vld [vmem:[%s3966_s1 + $0x328] sm:$0xff]  ;;  %v131_v48 = vld [vmem:[%s3966_s1 + $0x2a0] sm:$0xff]  ;;  %v130_v52 = vld [vmem:[%s3966_s1 + $0x298] sm:$0xff] }
  0x27   :  { %1822 = vmatpush3.msra.mxu1 %v158_v7  ;;  %1788 = vmatprep.subr.mxu0 %v141_v8  ;;  %v163_v49 = vld [vmem:[%s3966_s1 + $0x3a0] sm:$0xff]  ;;  %v162_v53 = vld [vmem:[%s3966_s1 + $0x398] sm:$0xff]  ;;  %v129_v56 = vld [vmem:[%s3966_s1 + $0x290] sm:$0xff] }
  0x28   :  { %1823 = vmatprep.subr.mxu1 %v173_v9  ;;  %1789 = vmatpush3.msra.mxu0 %v125_v10  ;;  %v115_v50 = vld [vmem:[%s3966_s1 + $0x220] sm:$0xff]  ;;  %v114_v54 = vld [vmem:[%s3966_s1 + $0x218] sm:$0xff]  ;;  %v161_v57 = vld [vmem:[%s3966_s1 + $0x390] sm:$0xff] }
  0x29   :  { %1824 = vmatpush3.msra.mxu1 %v157_v11  ;;  %1790 = vmatprep.subr.mxu0 %v140_v12  ;;  %v147_v51 = vld [vmem:[%s3966_s1 + $0x320] sm:$0xff]  ;;  %v146_v55 = vld [vmem:[%s3966_s1 + $0x318] sm:$0xff]  ;;  %v113_v58 = vld [vmem:[%s3966_s1 + $0x210] sm:$0xff] }
  0x2a   :  { %1825 = vmatprep.subr.mxu1 %v172_v13  ;;  %1791 = vmatpush3.msra.mxu0 %v124_v14  ;;  %v145_v59 = vld [vmem:[%s3966_s1 + $0x310] sm:$0xff]  ;;  %v128_v60 = vld [vmem:[%s3966_s1 + $0x288] sm:$0xff]  ;;  %v127_v0 = vld [vmem:[%s3966_s1 + $0x280] sm:$0xff] }
  0x2b   :  { %1826 = vmatpush3.msra.mxu1 %v156_v15  ;;  %1792 = vmatprep.subr.mxu0 %v139_v16  ;;  %v160_v61 = vld [vmem:[%s3966_s1 + $0x388] sm:$0xff]  ;;  %v159_v1 = vld [vmem:[%s3966_s1 + $0x380] sm:$0xff]  ;;  %v22_v6 = vld [vmem:[%s3965_s0 + $0x38] sm:$0xff] }
  0x2c   :  { %1827 = vmatprep.subr.mxu1 %v171_v17  ;;  %1793 = vmatpush3.msra.mxu0 %v123_v18  ;;  %v112_v62 = vld [vmem:[%s3966_s1 + $0x208] sm:$0xff]  ;;  %v111_v2 = vld [vmem:[%s3966_s1 + $0x200] sm:$0xff]  ;;  %v206_v7 = vld [vmem:[%s3966_s1 + $0x4f8] sm:$0xff] }
  0x2d   :  { %1828 = vmatpush3.msra.mxu1 %v155_v19  ;;  %1794 = vmatprep.subr.mxu0 %v138_v20  ;;  %v144_v63 = vld [vmem:[%s3966_s1 + $0x308] sm:$0xff]  ;;  %v143_v4 = vld [vmem:[%s3966_s1 + $0x300] sm:$0xff]  ;;  %v238_v8 = vld [vmem:[%s3966_s1 + $0x5f8] sm:$0xff] }
  0x2e   :  { %1829 = vmatprep.subr.mxu1 %v170_v21  ;;  %1795 = vmatpush3.msra.mxu0 %v122_v22  ;;  %v20_v3 = vld [vmem:[%s3965_s0 + $0x28] sm:$0xff]  ;;  %v19_v5 = vld [vmem:[%s3965_s0 + $0x20] sm:$0xff]  ;;  %v21_v9 = vld [vmem:[%s3965_s0 + $0x30] sm:$0xff] }
  0x2f   :  { %1830 = vmatpush3.msra.mxu1 %v154_v23  ;;  %1796 = vmatprep.subr.mxu0 %v137_v24  ;;  %v190_v10 = vld [vmem:[%s3966_s1 + $0x478] sm:$0xff]  ;;  %v205_v12 = vld [vmem:[%s3966_s1 + $0x4f0] sm:$0xff]  ;;  %v204_v16 = vld [vmem:[%s3966_s1 + $0x4e8] sm:$0xff] }
  0x30   :  { %1831 = vmatprep.subr.mxu1 %v169_v25  ;;  %1797 = vmatpush3.msra.mxu0 %v121_v26  ;;  %v222_v11 = vld [vmem:[%s3966_s1 + $0x578] sm:$0xff]  ;;  %v237_v13 = vld [vmem:[%s3966_s1 + $0x5f0] sm:$0xff]  ;;  %v236_v17 = vld [vmem:[%s3966_s1 + $0x5e8] sm:$0xff] }
  0x31   :  { %1832 = vmatpush3.msra.mxu1 %v153_v27  ;;  %1798 = vmatprep.subr.mxu0 %v136_v28  ;;  %v189_v14 = vld [vmem:[%s3966_s1 + $0x470] sm:$0xff]  ;;  %v188_v18 = vld [vmem:[%s3966_s1 + $0x468] sm:$0xff]  ;;  %v203_v20 = vld [vmem:[%s3966_s1 + $0x4e0] sm:$0xff] }
  0x32   :  { %1833 = vmatprep.subr.mxu1 %v168_v29  ;;  %1799 = vmatpush3.msra.mxu0 %v120_v30  ;;  %v221_v15 = vld [vmem:[%s3966_s1 + $0x570] sm:$0xff]  ;;  %v220_v19 = vld [vmem:[%s3966_s1 + $0x568] sm:$0xff]  ;;  %v235_v21 = vld [vmem:[%s3966_s1 + $0x5e0] sm:$0xff] }
  0x33   :  { %1834 = vmatpush3.msra.mxu1 %v152_v31  ;;  %1800 = vmatprep.subr.mxu0 %v135_v32  ;;  %v187_v22 = vld [vmem:[%s3966_s1 + $0x460] sm:$0xff]  ;;  %v202_v24 = vld [vmem:[%s3966_s1 + $0x4d8] sm:$0xff]  ;;  %v201_v28 = vld [vmem:[%s3966_s1 + $0x4d0] sm:$0xff] }
  0x34   :  { %1835 = vmatprep.subr.mxu1 %v167_v33  ;;  %1801 = vmatpush3.msra.mxu0 %v119_v34  ;;  %v219_v23 = vld [vmem:[%s3966_s1 + $0x560] sm:$0xff]  ;;  %v234_v25 = vld [vmem:[%s3966_s1 + $0x5d8] sm:$0xff]  ;;  %v233_v29 = vld [vmem:[%s3966_s1 + $0x5d0] sm:$0xff] }
  0x35   :  { %1836 = vmatpush3.msra.mxu1 %v151_v35  ;;  %1802 = vmatprep.subr.mxu0 %v134_v36  ;;  %v186_v26 = vld [vmem:[%s3966_s1 + $0x458] sm:$0xff]  ;;  %v185_v30 = vld [vmem:[%s3966_s1 + $0x450] sm:$0xff]  ;;  %v200_v32 = vld [vmem:[%s3966_s1 + $0x4c8] sm:$0xff] }
  0x36   :  { %1837 = vmatprep.subr.mxu1 %v166_v37  ;;  %1803 = vmatpush3.msra.mxu0 %v118_v38  ;;  %v218_v27 = vld [vmem:[%s3966_s1 + $0x558] sm:$0xff]  ;;  %v217_v31 = vld [vmem:[%s3966_s1 + $0x550] sm:$0xff]  ;;  %v232_v33 = vld [vmem:[%s3966_s1 + $0x5c8] sm:$0xff] }
  0x37   :  { %1838 = vmatpush3.msra.mxu1 %v150_v39  ;;  %1804 = vmatprep.subr.mxu0 %v133_v40  ;;  %v184_v34 = vld [vmem:[%s3966_s1 + $0x448] sm:$0xff]  ;;  %v199_v36 = vld [vmem:[%s3966_s1 + $0x4c0] sm:$0xff]  ;;  %v198_v40 = vld [vmem:[%s3966_s1 + $0x4b8] sm:$0xff] }
  0x38   :  { %1839 = vmatprep.subr.mxu1 %v165_v41  ;;  %1805 = vmatpush3.msra.mxu0 %v117_v42  ;;  %v216_v35 = vld [vmem:[%s3966_s1 + $0x548] sm:$0xff]  ;;  %v231_v37 = vld [vmem:[%s3966_s1 + $0x5c0] sm:$0xff]  ;;  %v230_v41 = vld [vmem:[%s3966_s1 + $0x5b8] sm:$0xff] }
  0x39   :  { %1840 = vmatpush3.msra.mxu1 %v149_v43  ;;  %1806 = vmatprep.subr.mxu0 %v132_v44  ;;  %v183_v38 = vld [vmem:[%s3966_s1 + $0x440] sm:$0xff]  ;;  %v182_v42 = vld [vmem:[%s3966_s1 + $0x438] sm:$0xff]  ;;  %v197_v44 = vld [vmem:[%s3966_s1 + $0x4b0] sm:$0xff] }
  0x3a   :  { %1841 = vmatprep.subr.mxu1 %v164_v45  ;;  %1807 = vmatpush3.msra.mxu0 %v116_v46  ;;  %v215_v39 = vld [vmem:[%s3966_s1 + $0x540] sm:$0xff]  ;;  %v214_v43 = vld [vmem:[%s3966_s1 + $0x538] sm:$0xff]  ;;  %v229_v45 = vld [vmem:[%s3966_s1 + $0x5b0] sm:$0xff] }
  0x3b   :  { %1842 = vmatpush3.msra.mxu1 %v148_v47  ;;  %1808 = vmatprep.subr.mxu0 %v131_v48  ;;  %v181_v46 = vld [vmem:[%s3966_s1 + $0x430] sm:$0xff]  ;;  %v196_v48 = vld [vmem:[%s3966_s1 + $0x4a8] sm:$0xff] }
  0x3c   :  { %1843 = vmatprep.subr.mxu1 %v163_v49  ;;  %1809 = vmatpush3.msra.mxu0 %v115_v50  ;;  %v213_v47 = vld [vmem:[%s3966_s1 + $0x530] sm:$0xff]  ;;  %v228_v49 = vld [vmem:[%s3966_s1 + $0x5a8] sm:$0xff] }
  0x3d   :  { %1844 = vmatpush3.msra.mxu1 %v147_v51  ;;  %1810 = vmatprep.subr.mxu0 %v130_v52  ;;  %v180_v50 = vld [vmem:[%s3966_s1 + $0x428] sm:$0xff]  ;;  %v195_v52 = vld [vmem:[%s3966_s1 + $0x4a0] sm:$0xff] }
  0x3e   :  { %1845 = vmatprep.subr.mxu1 %v162_v53  ;;  %1811 = vmatpush3.msra.mxu0 %v114_v54  ;;  %v212_v51 = vld [vmem:[%s3966_s1 + $0x528] sm:$0xff]  ;;  %v227_v53 = vld [vmem:[%s3966_s1 + $0x5a0] sm:$0xff] }
  0x3f   :  { %1846 = vmatpush3.msra.mxu1 %v146_v55  ;;  %1812 = vmatprep.subr.mxu0 %v129_v56  ;;  %v179_v54 = vld [vmem:[%s3966_s1 + $0x420] sm:$0xff]  ;;  %v194_v56 = vld [vmem:[%s3966_s1 + $0x498] sm:$0xff] }
  0x40   :  { %1847 = vmatprep.subr.mxu1 %v161_v57  ;;  %1813 = vmatpush3.msra.mxu0 %v113_v58  ;;  %v211_v55 = vld [vmem:[%s3966_s1 + $0x520] sm:$0xff]  ;;  %v226_v57 = vld [vmem:[%s3966_s1 + $0x598] sm:$0xff] }
  0x41   :  { %1848 = vmatpush3.msra.mxu1 %v145_v59  ;;  %1814 = vmatprep.subr.mxu0 %v128_v60  ;;  %v178_v58 = vld [vmem:[%s3966_s1 + $0x418] sm:$0xff]  ;;  %v193_v60 = vld [vmem:[%s3966_s1 + $0x490] sm:$0xff] }
  0x42   :  { %1849 = vmatprep.subr.mxu1 %v160_v61  ;;  %1815 = vmatpush3.msra.mxu0 %v112_v62  ;;  %v210_v59 = vld [vmem:[%s3966_s1 + $0x518] sm:$0xff]  ;;  %v225_v61 = vld [vmem:[%s3966_s1 + $0x590] sm:$0xff] }
  0x43   :  { %1850 = vmatpush3.msra.mxu1 %v144_v63  ;;  %1816 = vmatprep.subr.mxu0 %v127_v0  ;;  %v177_v62 = vld [vmem:[%s3966_s1 + $0x410] sm:$0xff]  ;;  %v192_v0 = vld [vmem:[%s3966_s1 + $0x488] sm:$0xff] }
  0x44   :  { %1851 = vmatprep.subr.mxu1 %v159_v1  ;;  %1817 = vmatpush3.msra.mxu0 %v111_v2  ;;  %v209_v63 = vld [vmem:[%s3966_s1 + $0x510] sm:$0xff]  ;;  %v224_v1 = vld [vmem:[%s3966_s1 + $0x588] sm:$0xff] }
  0x45   :  { %770 = vmatprep.mubr.f32.mxu0 %v20_v3  ;;  %1852 = vmatpush3.msra.mxu1 %v143_v4  ;;  %v176_v2 = vld [vmem:[%s3966_s1 + $0x408] sm:$0xff]  ;;  %v191_v4 = vld [vmem:[%s3966_s1 + $0x480] sm:$0xff] }
  0x46   :  { %771 = vmatmul.mubr.f32.vlgmr.msra.gmra.mxu0 %v19_v5  ;;  %840 = vmatprep.mubr.f32.mxu1 %v22_v6  ;;  %v208_v3 = vld [vmem:[%s3966_s1 + $0x508] sm:$0xff]  ;;  %v223_v5 = vld [vmem:[%s3966_s1 + $0x580] sm:$0xff] }
  0x47   :  { %1856 = vmatprep.subr.mxu0 %v206_v7  ;;  %1891 = vmatprep.subr.mxu1 %v238_v8  ;;  %v175_v6 = vld [vmem:[%s3966_s1 + $0x400] sm:$0xff]  ;;  %v24_v7 = vld [vmem:[%s3965_s0 + $0x48] sm:$0xff] }
  0x48   :  { %841 = vmatmul.mubr.f32.vlgmr.msra.gmra.mxu1 %v21_v9  ;;  %1857 = vmatpush3.msra.mxu0 %v190_v10  ;;  %v207_v8 = vld [vmem:[%s3966_s1 + $0x500] sm:$0xff]  ;;  %v26_v10 = vld [vmem:[%s3965_s0 + $0x58] sm:$0xff] }
  0x49   :  { %1892 = vmatpush3.msra.mxu1 %v222_v11  ;;  %1858 = vmatprep.subr.mxu0 %v205_v12  ;;  %v23_v9 = vld [vmem:[%s3965_s0 + $0x40] sm:$0xff]  ;;  %v270_v11 = vld [vmem:[%s3966_s1 + $0x6f8] sm:$0xff] }
  0x4a   :  { %1893 = vmatprep.subr.mxu1 %v237_v13  ;;  %1859 = vmatpush3.msra.mxu0 %v189_v14  ;;  %v302_v12 = vld [vmem:[%s3966_s1 + $0x7f8] sm:$0xff]  ;;  %v25_v13 = vld [vmem:[%s3965_s0 + $0x50] sm:$0xff] }
  0x4b   :  { %1894 = vmatpush3.msra.mxu1 %v221_v15  ;;  %1860 = vmatprep.subr.mxu0 %v204_v16  ;;  %v254_v14 = vld [vmem:[%s3966_s1 + $0x678] sm:$0xff]  ;;  %v269_v16 = vld [vmem:[%s3966_s1 + $0x6f0] sm:$0xff] }
  0x4c   :  { %1895 = vmatprep.subr.mxu1 %v236_v17  ;;  %1861 = vmatpush3.msra.mxu0 %v188_v18  ;;  %v286_v15 = vld [vmem:[%s3966_s1 + $0x778] sm:$0xff]  ;;  %v301_v17 = vld [vmem:[%s3966_s1 + $0x7f0] sm:$0xff] }
  0x4d   :  { %1896 = vmatpush3.msra.mxu1 %v220_v19  ;;  %1862 = vmatprep.subr.mxu0 %v203_v20  ;;  %v253_v18 = vld [vmem:[%s3966_s1 + $0x670] sm:$0xff]  ;;  %v268_v20 = vld [vmem:[%s3966_s1 + $0x6e8] sm:$0xff] }
  0x4e   :  { %1897 = vmatprep.subr.mxu1 %v235_v21  ;;  %1863 = vmatpush3.msra.mxu0 %v187_v22  ;;  %v285_v19 = vld [vmem:[%s3966_s1 + $0x770] sm:$0xff]  ;;  %v300_v21 = vld [vmem:[%s3966_s1 + $0x7e8] sm:$0xff] }
  0x4f   :  { %1898 = vmatpush3.msra.mxu1 %v219_v23  ;;  %1864 = vmatprep.subr.mxu0 %v202_v24  ;;  %v252_v22 = vld [vmem:[%s3966_s1 + $0x668] sm:$0xff]  ;;  %v267_v24 = vld [vmem:[%s3966_s1 + $0x6e0] sm:$0xff] }
  0x50   :  { %1899 = vmatprep.subr.mxu1 %v234_v25  ;;  %1865 = vmatpush3.msra.mxu0 %v186_v26  ;;  %v284_v23 = vld [vmem:[%s3966_s1 + $0x768] sm:$0xff]  ;;  %v299_v25 = vld [vmem:[%s3966_s1 + $0x7e0] sm:$0xff] }
  0x51   :  { %1900 = vmatpush3.msra.mxu1 %v218_v27  ;;  %1866 = vmatprep.subr.mxu0 %v201_v28  ;;  %v251_v26 = vld [vmem:[%s3966_s1 + $0x660] sm:$0xff]  ;;  %v266_v28 = vld [vmem:[%s3966_s1 + $0x6d8] sm:$0xff] }
  0x52   :  { %1901 = vmatprep.subr.mxu1 %v233_v29  ;;  %1867 = vmatpush3.msra.mxu0 %v185_v30  ;;  %v283_v27 = vld [vmem:[%s3966_s1 + $0x760] sm:$0xff]  ;;  %v298_v29 = vld [vmem:[%s3966_s1 + $0x7d8] sm:$0xff] }
  0x53   :  { %1902 = vmatpush3.msra.mxu1 %v217_v31  ;;  %1868 = vmatprep.subr.mxu0 %v200_v32  ;;  %v250_v30 = vld [vmem:[%s3966_s1 + $0x658] sm:$0xff]  ;;  %v265_v32 = vld [vmem:[%s3966_s1 + $0x6d0] sm:$0xff] }
  0x54   :  { %1903 = vmatprep.subr.mxu1 %v232_v33  ;;  %1869 = vmatpush3.msra.mxu0 %v184_v34  ;;  %v282_v31 = vld [vmem:[%s3966_s1 + $0x758] sm:$0xff]  ;;  %v297_v33 = vld [vmem:[%s3966_s1 + $0x7d0] sm:$0xff] }
  0x55   :  { %1904 = vmatpush3.msra.mxu1 %v216_v35  ;;  %1870 = vmatprep.subr.mxu0 %v199_v36  ;;  %v249_v34 = vld [vmem:[%s3966_s1 + $0x650] sm:$0xff]  ;;  %v264_v36 = vld [vmem:[%s3966_s1 + $0x6c8] sm:$0xff] }
  0x56   :  { %1905 = vmatprep.subr.mxu1 %v231_v37  ;;  %1871 = vmatpush3.msra.mxu0 %v183_v38  ;;  %v281_v35 = vld [vmem:[%s3966_s1 + $0x750] sm:$0xff]  ;;  %v296_v37 = vld [vmem:[%s3966_s1 + $0x7c8] sm:$0xff] }
  0x57   :  { %1906 = vmatpush3.msra.mxu1 %v215_v39  ;;  %1872 = vmatprep.subr.mxu0 %v198_v40  ;;  %v248_v38 = vld [vmem:[%s3966_s1 + $0x648] sm:$0xff]  ;;  %v263_v40 = vld [vmem:[%s3966_s1 + $0x6c0] sm:$0xff] }
  0x58   :  { %1907 = vmatprep.subr.mxu1 %v230_v41  ;;  %1873 = vmatpush3.msra.mxu0 %v182_v42  ;;  %v280_v39 = vld [vmem:[%s3966_s1 + $0x748] sm:$0xff]  ;;  %v295_v41 = vld [vmem:[%s3966_s1 + $0x7c0] sm:$0xff] }
  0x59   :  { %1908 = vmatpush3.msra.mxu1 %v214_v43  ;;  %1874 = vmatprep.subr.mxu0 %v197_v44  ;;  %v247_v42 = vld [vmem:[%s3966_s1 + $0x640] sm:$0xff]  ;;  %v262_v44 = vld [vmem:[%s3966_s1 + $0x6b8] sm:$0xff] }
  0x5a   :  { %1909 = vmatprep.subr.mxu1 %v229_v45  ;;  %1875 = vmatpush3.msra.mxu0 %v181_v46  ;;  %v279_v43 = vld [vmem:[%s3966_s1 + $0x740] sm:$0xff]  ;;  %v294_v45 = vld [vmem:[%s3966_s1 + $0x7b8] sm:$0xff] }
  0x5b   :  { %1910 = vmatpush3.msra.mxu1 %v213_v47  ;;  %1876 = vmatprep.subr.mxu0 %v196_v48  ;;  %v246_v46 = vld [vmem:[%s3966_s1 + $0x638] sm:$0xff]  ;;  %v261_v48 = vld [vmem:[%s3966_s1 + $0x6b0] sm:$0xff] }
  0x5c   :  { %1911 = vmatprep.subr.mxu1 %v228_v49  ;;  %1877 = vmatpush3.msra.mxu0 %v180_v50  ;;  %v278_v47 = vld [vmem:[%s3966_s1 + $0x738] sm:$0xff]  ;;  %v293_v49 = vld [vmem:[%s3966_s1 + $0x7b0] sm:$0xff] }
  0x5d   :  { %1912 = vmatpush3.msra.mxu1 %v212_v51  ;;  %1878 = vmatprep.subr.mxu0 %v195_v52  ;;  %v245_v50 = vld [vmem:[%s3966_s1 + $0x630] sm:$0xff]  ;;  %v260_v52 = vld [vmem:[%s3966_s1 + $0x6a8] sm:$0xff] }
  0x5e   :  { %1913 = vmatprep.subr.mxu1 %v227_v53  ;;  %1879 = vmatpush3.msra.mxu0 %v179_v54  ;;  %v277_v51 = vld [vmem:[%s3966_s1 + $0x730] sm:$0xff]  ;;  %v292_v53 = vld [vmem:[%s3966_s1 + $0x7a8] sm:$0xff] }
  0x5f   :  { %1914 = vmatpush3.msra.mxu1 %v211_v55  ;;  %1880 = vmatprep.subr.mxu0 %v194_v56  ;;  %v244_v54 = vld [vmem:[%s3966_s1 + $0x628] sm:$0xff]  ;;  %v259_v56 = vld [vmem:[%s3966_s1 + $0x6a0] sm:$0xff] }
  0x60   :  { %1915 = vmatprep.subr.mxu1 %v226_v57  ;;  %1881 = vmatpush3.msra.mxu0 %v178_v58  ;;  %v276_v55 = vld [vmem:[%s3966_s1 + $0x728] sm:$0xff]  ;;  %v291_v57 = vld [vmem:[%s3966_s1 + $0x7a0] sm:$0xff] }
  0x61   :  { %1916 = vmatpush3.msra.mxu1 %v210_v59  ;;  %1882 = vmatprep.subr.mxu0 %v193_v60  ;;  %v243_v58 = vld [vmem:[%s3966_s1 + $0x620] sm:$0xff]  ;;  %v258_v60 = vld [vmem:[%s3966_s1 + $0x698] sm:$0xff] }
  0x62   :  { %1917 = vmatprep.subr.mxu1 %v225_v61  ;;  %1883 = vmatpush3.msra.mxu0 %v177_v62  ;;  %v275_v59 = vld [vmem:[%s3966_s1 + $0x720] sm:$0xff]  ;;  %v290_v61 = vld [vmem:[%s3966_s1 + $0x798] sm:$0xff] }
  0x63   :  { %1918 = vmatpush3.msra.mxu1 %v209_v63  ;;  %1884 = vmatprep.subr.mxu0 %v192_v0  ;;  %v242_v62 = vld [vmem:[%s3966_s1 + $0x618] sm:$0xff]  ;;  %v257_v0 = vld [vmem:[%s3966_s1 + $0x690] sm:$0xff] }
  0x64   :  { %1919 = vmatprep.subr.mxu1 %v224_v1  ;;  %1885 = vmatpush3.msra.mxu0 %v176_v2  ;;  %v274_v63 = vld [vmem:[%s3966_s1 + $0x718] sm:$0xff]  ;;  %v289_v1 = vld [vmem:[%s3966_s1 + $0x790] sm:$0xff] }
  0x65   :  { %1920 = vmatpush3.msra.mxu1 %v208_v3  ;;  %1886 = vmatprep.subr.mxu0 %v191_v4  ;;  %v241_v2 = vld [vmem:[%s3966_s1 + $0x610] sm:$0xff]  ;;  %v256_v4 = vld [vmem:[%s3966_s1 + $0x688] sm:$0xff] }
  0x66   :  { %1921 = vmatprep.subr.mxu1 %v223_v5  ;;  %1887 = vmatpush3.msra.mxu0 %v175_v6  ;;  %v273_v3 = vld [vmem:[%s3966_s1 + $0x710] sm:$0xff]  ;;  %v288_v5 = vld [vmem:[%s3966_s1 + $0x788] sm:$0xff] }
  0x67   :  { %910 = vmatprep.mubr.f32.mxu0 %v24_v7  ;;  %1922 = vmatpush3.msra.mxu1 %v207_v8  ;;  %v240_v6 = vld [vmem:[%s3966_s1 + $0x608] sm:$0xff]  ;;  %v255_v8 = vld [vmem:[%s3966_s1 + $0x680] sm:$0xff] }
  0x68   :  { %911 = vmatmul.mubr.f32.vlgmr.msra.gmra.mxu0 %v23_v9  ;;  %980 = vmatprep.mubr.f32.mxu1 %v26_v10  ;;  %v272_v7 = vld [vmem:[%s3966_s1 + $0x708] sm:$0xff]  ;;  %v287_v9 = vld [vmem:[%s3966_s1 + $0x780] sm:$0xff] }
  0x69   :  { %1926 = vmatprep.subr.mxu0 %v270_v11  ;;  %1961 = vmatprep.subr.mxu1 %v302_v12  ;;  %v239_v10 = vld [vmem:[%s3966_s1 + $0x600] sm:$0xff]  ;;  %v28_v11 = vld [vmem:[%s3965_s0 + $0x68] sm:$0xff] }
  0x6a   :  { %981 = vmatmul.mubr.f32.vlgmr.msra.gmra.mxu1 %v25_v13  ;;  %1927 = vmatpush3.msra.mxu0 %v254_v14  ;;  %v271_v12 = vld [vmem:[%s3966_s1 + $0x700] sm:$0xff]  ;;  %v30_v14 = vld [vmem:[%s3965_s0 + $0x78] sm:$0xff] }
  0x6b   :  { %1962 = vmatpush3.msra.mxu1 %v286_v15  ;;  %1928 = vmatprep.subr.mxu0 %v269_v16  ;;  %v27_v13 = vld [vmem:[%s3965_s0 + $0x60] sm:$0xff]  ;;  %v334_v15 = vld [vmem:[%s3966_s1 + $0x8f8] sm:$0xff] }
  0x6c   :  { %1963 = vmatprep.subr.mxu1 %v301_v17  ;;  %1929 = vmatpush3.msra.mxu0 %v253_v18  ;;  %v366_v16 = vld [vmem:[%s3966_s1 + $0x9f8] sm:$0xff]  ;;  %v29_v17 = vld [vmem:[%s3965_s0 + $0x70] sm:$0xff] }
  0x6d   :  { %1964 = vmatpush3.msra.mxu1 %v285_v19  ;;  %1930 = vmatprep.subr.mxu0 %v268_v20  ;;  %v318_v18 = vld [vmem:[%s3966_s1 + $0x878] sm:$0xff]  ;;  %v333_v20 = vld [vmem:[%s3966_s1 + $0x8f0] sm:$0xff] }
  0x6e   :  { %1965 = vmatprep.subr.mxu1 %v300_v21  ;;  %1931 = vmatpush3.msra.mxu0 %v252_v22  ;;  %v350_v19 = vld [vmem:[%s3966_s1 + $0x978] sm:$0xff]  ;;  %v365_v21 = vld [vmem:[%s3966_s1 + $0x9f0] sm:$0xff] }
  0x6f   :  { %1966 = vmatpush3.msra.mxu1 %v284_v23  ;;  %1932 = vmatprep.subr.mxu0 %v267_v24  ;;  %v317_v22 = vld [vmem:[%s3966_s1 + $0x870] sm:$0xff]  ;;  %v332_v24 = vld [vmem:[%s3966_s1 + $0x8e8] sm:$0xff] }
  0x70   :  { %1967 = vmatprep.subr.mxu1 %v299_v25  ;;  %1933 = vmatpush3.msra.mxu0 %v251_v26  ;;  %v349_v23 = vld [vmem:[%s3966_s1 + $0x970] sm:$0xff]  ;;  %v364_v25 = vld [vmem:[%s3966_s1 + $0x9e8] sm:$0xff] }
  0x71   :  { %1968 = vmatpush3.msra.mxu1 %v283_v27  ;;  %1934 = vmatprep.subr.mxu0 %v266_v28  ;;  %v316_v26 = vld [vmem:[%s3966_s1 + $0x868] sm:$0xff]  ;;  %v331_v28 = vld [vmem:[%s3966_s1 + $0x8e0] sm:$0xff] }
  0x72   :  { %1969 = vmatprep.subr.mxu1 %v298_v29  ;;  %1935 = vmatpush3.msra.mxu0 %v250_v30  ;;  %v348_v27 = vld [vmem:[%s3966_s1 + $0x968] sm:$0xff]  ;;  %v363_v29 = vld [vmem:[%s3966_s1 + $0x9e0] sm:$0xff] }
  0x73   :  { %1970 = vmatpush3.msra.mxu1 %v282_v31  ;;  %1936 = vmatprep.subr.mxu0 %v265_v32  ;;  %v315_v30 = vld [vmem:[%s3966_s1 + $0x860] sm:$0xff]  ;;  %v330_v32 = vld [vmem:[%s3966_s1 + $0x8d8] sm:$0xff] }
  0x74   :  { %1971 = vmatprep.subr.mxu1 %v297_v33  ;;  %1937 = vmatpush3.msra.mxu0 %v249_v34  ;;  %v347_v31 = vld [vmem:[%s3966_s1 + $0x960] sm:$0xff]  ;;  %v362_v33 = vld [vmem:[%s3966_s1 + $0x9d8] sm:$0xff] }
  0x75   :  { %1972 = vmatpush3.msra.mxu1 %v281_v35  ;;  %1938 = vmatprep.subr.mxu0 %v264_v36  ;;  %v314_v34 = vld [vmem:[%s3966_s1 + $0x858] sm:$0xff]  ;;  %v329_v36 = vld [vmem:[%s3966_s1 + $0x8d0] sm:$0xff] }
  0x76   :  { %1973 = vmatprep.subr.mxu1 %v296_v37  ;;  %1939 = vmatpush3.msra.mxu0 %v248_v38  ;;  %v346_v35 = vld [vmem:[%s3966_s1 + $0x958] sm:$0xff]  ;;  %v361_v37 = vld [vmem:[%s3966_s1 + $0x9d0] sm:$0xff] }
  0x77   :  { %1974 = vmatpush3.msra.mxu1 %v280_v39  ;;  %1940 = vmatprep.subr.mxu0 %v263_v40  ;;  %v313_v38 = vld [vmem:[%s3966_s1 + $0x850] sm:$0xff]  ;;  %v328_v40 = vld [vmem:[%s3966_s1 + $0x8c8] sm:$0xff] }
  0x78   :  { %1975 = vmatprep.subr.mxu1 %v295_v41  ;;  %1941 = vmatpush3.msra.mxu0 %v247_v42  ;;  %v345_v39 = vld [vmem:[%s3966_s1 + $0x950] sm:$0xff]  ;;  %v360_v41 = vld [vmem:[%s3966_s1 + $0x9c8] sm:$0xff] }
  0x79   :  { %1976 = vmatpush3.msra.mxu1 %v279_v43  ;;  %1942 = vmatprep.subr.mxu0 %v262_v44  ;;  %v312_v42 = vld [vmem:[%s3966_s1 + $0x848] sm:$0xff]  ;;  %v327_v44 = vld [vmem:[%s3966_s1 + $0x8c0] sm:$0xff] }
  0x7a   :  { %1977 = vmatprep.subr.mxu1 %v294_v45  ;;  %1943 = vmatpush3.msra.mxu0 %v246_v46  ;;  %v344_v43 = vld [vmem:[%s3966_s1 + $0x948] sm:$0xff]  ;;  %v359_v45 = vld [vmem:[%s3966_s1 + $0x9c0] sm:$0xff] }
  0x7b   :  { %1978 = vmatpush3.msra.mxu1 %v278_v47  ;;  %1944 = vmatprep.subr.mxu0 %v261_v48  ;;  %v311_v46 = vld [vmem:[%s3966_s1 + $0x840] sm:$0xff]  ;;  %v326_v48 = vld [vmem:[%s3966_s1 + $0x8b8] sm:$0xff] }
  0x7c   :  { %1979 = vmatprep.subr.mxu1 %v293_v49  ;;  %1945 = vmatpush3.msra.mxu0 %v245_v50  ;;  %v343_v47 = vld [vmem:[%s3966_s1 + $0x940] sm:$0xff]  ;;  %v358_v49 = vld [vmem:[%s3966_s1 + $0x9b8] sm:$0xff] }
  0x7d   :  { %1980 = vmatpush3.msra.mxu1 %v277_v51  ;;  %1946 = vmatprep.subr.mxu0 %v260_v52  ;;  %v310_v50 = vld [vmem:[%s3966_s1 + $0x838] sm:$0xff]  ;;  %v325_v52 = vld [vmem:[%s3966_s1 + $0x8b0] sm:$0xff] }
  0x7e   :  { %1981 = vmatprep.subr.mxu1 %v292_v53  ;;  %1947 = vmatpush3.msra.mxu0 %v244_v54  ;;  %v342_v51 = vld [vmem:[%s3966_s1 + $0x938] sm:$0xff]  ;;  %v357_v53 = vld [vmem:[%s3966_s1 + $0x9b0] sm:$0xff] }
  0x7f   :  { %1982 = vmatpush3.msra.mxu1 %v276_v55  ;;  %1948 = vmatprep.subr.mxu0 %v259_v56  ;;  %v309_v54 = vld [vmem:[%s3966_s1 + $0x830] sm:$0xff]  ;;  %v324_v56 = vld [vmem:[%s3966_s1 + $0x8a8] sm:$0xff] }
  0x80   :  { %1983 = vmatprep.subr.mxu1 %v291_v57  ;;  %1949 = vmatpush3.msra.mxu0 %v243_v58  ;;  %v341_v55 = vld [vmem:[%s3966_s1 + $0x930] sm:$0xff]  ;;  %v356_v57 = vld [vmem:[%s3966_s1 + $0x9a8] sm:$0xff] }
  0x81   :  { %1984 = vmatpush3.msra.mxu1 %v275_v59  ;;  %1950 = vmatprep.subr.mxu0 %v258_v60  ;;  %v308_v58 = vld [vmem:[%s3966_s1 + $0x828] sm:$0xff]  ;;  %v323_v60 = vld [vmem:[%s3966_s1 + $0x8a0] sm:$0xff] }
  0x82   :  { %1985 = vmatprep.subr.mxu1 %v290_v61  ;;  %1951 = vmatpush3.msra.mxu0 %v242_v62  ;;  %v340_v59 = vld [vmem:[%s3966_s1 + $0x928] sm:$0xff]  ;;  %v355_v61 = vld [vmem:[%s3966_s1 + $0x9a0] sm:$0xff] }
  0x83   :  { %1986 = vmatpush3.msra.mxu1 %v274_v63  ;;  %1952 = vmatprep.subr.mxu0 %v257_v0  ;;  %v307_v62 = vld [vmem:[%s3966_s1 + $0x820] sm:$0xff]  ;;  %v322_v0 = vld [vmem:[%s3966_s1 + $0x898] sm:$0xff] }
  0x84   :  { %1987 = vmatprep.subr.mxu1 %v289_v1  ;;  %1953 = vmatpush3.msra.mxu0 %v241_v2  ;;  %v339_v63 = vld [vmem:[%s3966_s1 + $0x920] sm:$0xff]  ;;  %v354_v1 = vld [vmem:[%s3966_s1 + $0x998] sm:$0xff] }
  0x85   :  { %1988 = vmatpush3.msra.mxu1 %v273_v3  ;;  %1954 = vmatprep.subr.mxu0 %v256_v4  ;;  %v306_v2 = vld [vmem:[%s3966_s1 + $0x818] sm:$0xff]  ;;  %v321_v4 = vld [vmem:[%s3966_s1 + $0x890] sm:$0xff] }
  0x86   :  { %1989 = vmatprep.subr.mxu1 %v288_v5  ;;  %1955 = vmatpush3.msra.mxu0 %v240_v6  ;;  %v338_v3 = vld [vmem:[%s3966_s1 + $0x918] sm:$0xff]  ;;  %v353_v5 = vld [vmem:[%s3966_s1 + $0x990] sm:$0xff] }
  0x87   :  { %1990 = vmatpush3.msra.mxu1 %v272_v7  ;;  %1956 = vmatprep.subr.mxu0 %v255_v8  ;;  %v305_v6 = vld [vmem:[%s3966_s1 + $0x810] sm:$0xff]  ;;  %v320_v8 = vld [vmem:[%s3966_s1 + $0x888] sm:$0xff] }
  0x88   :  { %1991 = vmatprep.subr.mxu1 %v287_v9  ;;  %1957 = vmatpush3.msra.mxu0 %v239_v10  ;;  %v337_v7 = vld [vmem:[%s3966_s1 + $0x910] sm:$0xff]  ;;  %v352_v9 = vld [vmem:[%s3966_s1 + $0x988] sm:$0xff] }
  0x89   :  { %1050 = vmatprep.mubr.f32.mxu0 %v28_v11  ;;  %1992 = vmatpush3.msra.mxu1 %v271_v12  ;;  %v304_v10 = vld [vmem:[%s3966_s1 + $0x808] sm:$0xff]  ;;  %v319_v12 = vld [vmem:[%s3966_s1 + $0x880] sm:$0xff] }
  0x8a   :  { %1051 = vmatmul.mubr.f32.vlgmr.msra.gmra.mxu0 %v27_v13  ;;  %1120 = vmatprep.mubr.f32.mxu1 %v30_v14  ;;  %v336_v11 = vld [vmem:[%s3966_s1 + $0x908] sm:$0xff]  ;;  %v351_v13 = vld [vmem:[%s3966_s1 + $0x980] sm:$0xff] }
  0x8b   :  { %1996 = vmatprep.subr.mxu0 %v334_v15  ;;  %2031 = vmatprep.subr.mxu1 %v366_v16  ;;  %v303_v14 = vld [vmem:[%s3966_s1 + $0x800] sm:$0xff]  ;;  %v32_v15 = vld [vmem:[%s3965_s0 + $0x88] sm:$0xff] }
  0x8c   :  { %1121 = vmatmul.mubr.f32.vlgmr.msra.gmra.mxu1 %v29_v17  ;;  %1997 = vmatpush3.msra.mxu0 %v318_v18  ;;  %v335_v16 = vld [vmem:[%s3966_s1 + $0x900] sm:$0xff]  ;;  %v34_v18 = vld [vmem:[%s3965_s0 + $0x98] sm:$0xff] }
  0x8d   :  { %2032 = vmatpush3.msra.mxu1 %v350_v19  ;;  %1998 = vmatprep.subr.mxu0 %v333_v20  ;;  %v31_v17 = vld [vmem:[%s3965_s0 + $0x80] sm:$0xff]  ;;  %v398_v19 = vld [vmem:[%s3966_s1 + $0xaf8] sm:$0xff] }
  0x8e   :  { %2033 = vmatprep.subr.mxu1 %v365_v21  ;;  %1999 = vmatpush3.msra.mxu0 %v317_v22  ;;  %v430_v20 = vld [vmem:[%s3966_s1 + $0xbf8] sm:$0xff]  ;;  %v33_v21 = vld [vmem:[%s3965_s0 + $0x90] sm:$0xff] }
  0x8f   :  { %2034 = vmatpush3.msra.mxu1 %v349_v23  ;;  %2000 = vmatprep.subr.mxu0 %v332_v24  ;;  %v382_v22 = vld [vmem:[%s3966_s1 + $0xa78] sm:$0xff]  ;;  %v397_v24 = vld [vmem:[%s3966_s1 + $0xaf0] sm:$0xff] }
  0x90   :  { %2035 = vmatprep.subr.mxu1 %v364_v25  ;;  %2001 = vmatpush3.msra.mxu0 %v316_v26  ;;  %v414_v23 = vld [vmem:[%s3966_s1 + $0xb78] sm:$0xff]  ;;  %v429_v25 = vld [vmem:[%s3966_s1 + $0xbf0] sm:$0xff] }
  0x91   :  { %2036 = vmatpush3.msra.mxu1 %v348_v27  ;;  %2002 = vmatprep.subr.mxu0 %v331_v28  ;;  %v381_v26 = vld [vmem:[%s3966_s1 + $0xa70] sm:$0xff]  ;;  %v396_v28 = vld [vmem:[%s3966_s1 + $0xae8] sm:$0xff] }
  0x92   :  { %2037 = vmatprep.subr.mxu1 %v363_v29  ;;  %2003 = vmatpush3.msra.mxu0 %v315_v30  ;;  %v413_v27 = vld [vmem:[%s3966_s1 + $0xb70] sm:$0xff]  ;;  %v428_v29 = vld [vmem:[%s3966_s1 + $0xbe8] sm:$0xff] }
  0x93   :  { %2038 = vmatpush3.msra.mxu1 %v347_v31  ;;  %2004 = vmatprep.subr.mxu0 %v330_v32  ;;  %v380_v30 = vld [vmem:[%s3966_s1 + $0xa68] sm:$0xff]  ;;  %v395_v32 = vld [vmem:[%s3966_s1 + $0xae0] sm:$0xff] }
  0x94   :  { %2039 = vmatprep.subr.mxu1 %v362_v33  ;;  %2005 = vmatpush3.msra.mxu0 %v314_v34  ;;  %v412_v31 = vld [vmem:[%s3966_s1 + $0xb68] sm:$0xff]  ;;  %v427_v33 = vld [vmem:[%s3966_s1 + $0xbe0] sm:$0xff] }
  0x95   :  { %2040 = vmatpush3.msra.mxu1 %v346_v35  ;;  %2006 = vmatprep.subr.mxu0 %v329_v36  ;;  %v379_v34 = vld [vmem:[%s3966_s1 + $0xa60] sm:$0xff]  ;;  %v394_v36 = vld [vmem:[%s3966_s1 + $0xad8] sm:$0xff] }
  0x96   :  { %2041 = vmatprep.subr.mxu1 %v361_v37  ;;  %2007 = vmatpush3.msra.mxu0 %v313_v38  ;;  %v411_v35 = vld [vmem:[%s3966_s1 + $0xb60] sm:$0xff]  ;;  %v426_v37 = vld [vmem:[%s3966_s1 + $0xbd8] sm:$0xff] }
  0x97   :  { %2042 = vmatpush3.msra.mxu1 %v345_v39  ;;  %2008 = vmatprep.subr.mxu0 %v328_v40  ;;  %v378_v38 = vld [vmem:[%s3966_s1 + $0xa58] sm:$0xff]  ;;  %v393_v40 = vld [vmem:[%s3966_s1 + $0xad0] sm:$0xff] }
  0x98   :  { %2043 = vmatprep.subr.mxu1 %v360_v41  ;;  %2009 = vmatpush3.msra.mxu0 %v312_v42  ;;  %v410_v39 = vld [vmem:[%s3966_s1 + $0xb58] sm:$0xff]  ;;  %v425_v41 = vld [vmem:[%s3966_s1 + $0xbd0] sm:$0xff] }
  0x99   :  { %2044 = vmatpush3.msra.mxu1 %v344_v43  ;;  %2010 = vmatprep.subr.mxu0 %v327_v44  ;;  %v377_v42 = vld [vmem:[%s3966_s1 + $0xa50] sm:$0xff]  ;;  %v392_v44 = vld [vmem:[%s3966_s1 + $0xac8] sm:$0xff] }
  0x9a   :  { %2045 = vmatprep.subr.mxu1 %v359_v45  ;;  %2011 = vmatpush3.msra.mxu0 %v311_v46  ;;  %v409_v43 = vld [vmem:[%s3966_s1 + $0xb50] sm:$0xff]  ;;  %v424_v45 = vld [vmem:[%s3966_s1 + $0xbc8] sm:$0xff] }
  0x9b   :  { %2046 = vmatpush3.msra.mxu1 %v343_v47  ;;  %2012 = vmatprep.subr.mxu0 %v326_v48  ;;  %v376_v46 = vld [vmem:[%s3966_s1 + $0xa48] sm:$0xff] }
  0x9c   :  { %2047 = vmatprep.subr.mxu1 %v358_v49  ;;  %2013 = vmatpush3.msra.mxu0 %v310_v50  ;;  %v408_v47 = vld [vmem:[%s3966_s1 + $0xb48] sm:$0xff] }
  0x9d   :  { %2048 = vmatpush3.msra.mxu1 %v342_v51  ;;  %2014 = vmatprep.subr.mxu0 %v325_v52 }
  0x9e   :  { %2049 = vmatprep.subr.mxu1 %v357_v53  ;;  %2015 = vmatpush3.msra.mxu0 %v309_v54 }
  0x9f   :  { %2050 = vmatpush3.msra.mxu1 %v341_v55  ;;  %2016 = vmatprep.subr.mxu0 %v324_v56 }
  0xa0   :  { %2051 = vmatprep.subr.mxu1 %v356_v57  ;;  %2017 = vmatpush3.msra.mxu0 %v308_v58 }
  0xa1   :  { %2052 = vmatpush3.msra.mxu1 %v340_v59  ;;  %2018 = vmatprep.subr.mxu0 %v323_v60 }
  0xa2   :  { %2053 = vmatprep.subr.mxu1 %v355_v61  ;;  %2019 = vmatpush3.msra.mxu0 %v307_v62 }
  0xa3   :  { %2054 = vmatpush3.msra.mxu1 %v339_v63  ;;  %2020 = vmatprep.subr.mxu0 %v322_v0 }
  0xa4   :  { %2055 = vmatprep.subr.mxu1 %v354_v1  ;;  %2021 = vmatpush3.msra.mxu0 %v306_v2 }
  0xa5   :  { %2056 = vmatpush3.msra.mxu1 %v338_v3  ;;  %2022 = vmatprep.subr.mxu0 %v321_v4 }
  0xa6   :  { %2057 = vmatprep.subr.mxu1 %v353_v5  ;;  %2023 = vmatpush3.msra.mxu0 %v305_v6 }
  0xa7   :  { %2058 = vmatpush3.msra.mxu1 %v337_v7  ;;  %2024 = vmatprep.subr.mxu0 %v320_v8 }
  0xa8   :  { %2059 = vmatprep.subr.mxu1 %v352_v9  ;;  %2025 = vmatpush3.msra.mxu0 %v304_v10 }
  0xa9   :  { %2060 = vmatpush3.msra.mxu1 %v336_v11  ;;  %2026 = vmatprep.subr.mxu0 %v319_v12 }
  0xaa   :  { %2061 = vmatprep.subr.mxu1 %v351_v13  ;;  %2027 = vmatpush3.msra.mxu0 %v303_v14 }
  0xab   :  { %1190 = vmatprep.mubr.f32.mxu0 %v32_v15  ;;  %2062 = vmatpush3.msra.mxu1 %v335_v16 }
  0xac   :  { %1191 = vmatmul.mubr.f32.vlgmr.msra.gmra.mxu0 %v31_v17  ;;  %1260 = vmatprep.mubr.f32.mxu1 %v34_v18 }
  0xad   :  { %2066 = vmatprep.subr.mxu0 %v398_v19  ;;  %2101 = vmatprep.subr.mxu1 %v430_v20 }
  0xae   :  { %1261 = vmatmul.mubr.f32.vlgmr.msra.gmra.mxu1 %v33_v21  ;;  %2067 = vmatpush3.msra.mxu0 %v382_v22 }
  0xaf   :  { %2102 = vmatpush3.msra.mxu1 %v414_v23  ;;  %2068 = vmatprep.subr.mxu0 %v397_v24 }
  0xb0   :  { %2103 = vmatprep.subr.mxu1 %v429_v25  ;;  %2069 = vmatpush3.msra.mxu0 %v381_v26 }
  0xb1   :  { %2104 = vmatpush3.msra.mxu1 %v413_v27  ;;  %2070 = vmatprep.subr.mxu0 %v396_v28 }
  0xb2   :  { %2105 = vmatprep.subr.mxu1 %v428_v29  ;;  %2071 = vmatpush3.msra.mxu0 %v380_v30 }
  0xb3   :  { %2106 = vmatpush3.msra.mxu1 %v412_v31  ;;  %2072 = vmatprep.subr.mxu0 %v395_v32 }
  0xb4   :  { %2107 = vmatprep.subr.mxu1 %v427_v33  ;;  %2073 = vmatpush3.msra.mxu0 %v379_v34 }
  0xb5   :  { %2108 = vmatpush3.msra.mxu1 %v411_v35  ;;  %2074 = vmatprep.subr.mxu0 %v394_v36 }
  0xb6   :  { %2109 = vmatprep.subr.mxu1 %v426_v37  ;;  %2075 = vmatpush3.msra.mxu0 %v378_v38 }
  0xb7   :  { %2110 = vmatpush3.msra.mxu1 %v410_v39  ;;  %2076 = vmatprep.subr.mxu0 %v393_v40 }
  0xb8   :  { %2111 = vmatprep.subr.mxu1 %v425_v41 }
  0xb9   :  { %8 = vsyncpa [#allocation3], 0  ;;  %2077 = vmatpush3.msra.mxu0 %v377_v42  ;;  %2112 = vmatpush3.msra.mxu1 %v409_v43  ;;  %v391_v48 = vld [vmem:[%s3966_s1 + $0xac0] sm:$0xff]  ;;  %v390_v52 = vld [vmem:[%s3966_s1 + $0xab8] sm:$0xff]  ;;  %vm1686_vm0 = vcmask 80896  }
  0xba   :  { %v423_v49 = vld [vmem:[%s3966_s1 + $0xbc0] sm:$0xff]  ;;  %2078 = vmatprep.subr.mxu0 %v392_v44  ;;  %2113 = vmatprep.subr.mxu1 %v424_v45  ;;  %v422_v53 = vld [vmem:[%s3966_s1 + $0xbb8] sm:$0xff]  ;;  %v389_v56 = vld [vmem:[%s3966_s1 + $0xab0] sm:$0xff] }
  0xbb   :  { %v375_v50 = vld [vmem:[%s3966_s1 + $0xa40] sm:$0xff]  ;;  %2079 = vmatpush3.msra.mxu0 %v376_v46  ;;  %2114 = vmatpush3.msra.mxu1 %v408_v47  ;;  %v374_v54 = vld [vmem:[%s3966_s1 + $0xa38] sm:$0xff]  ;;  %v421_v57 = vld [vmem:[%s3966_s1 + $0xbb0] sm:$0xff] }
  0xbc   :  { %v407_v51 = vld [vmem:[%s3966_s1 + $0xb40] sm:$0xff]  ;;  %2080 = vmatprep.subr.mxu0 %v391_v48  ;;  %2115 = vmatprep.subr.mxu1 %v423_v49  ;;  %v406_v55 = vld [vmem:[%s3966_s1 + $0xb38] sm:$0xff]  ;;  %v373_v58 = vld [vmem:[%s3966_s1 + $0xa30] sm:$0xff] }
  0xbd   :  { %2081 = vmatpush3.msra.mxu0 %v375_v50  ;;  %2116 = vmatpush3.msra.mxu1 %v407_v51  ;;  %v405_v59 = vld [vmem:[%s3966_s1 + $0xb30] sm:$0xff]  ;;  %v388_v60 = vld [vmem:[%s3966_s1 + $0xaa8] sm:$0xff]  ;;  %v387_v0 = vld [vmem:[%s3966_s1 + $0xaa0] sm:$0xff] }
  0xbe   :  { %2082 = vmatprep.subr.mxu0 %v390_v52  ;;  %2117 = vmatprep.subr.mxu1 %v422_v53  ;;  %v420_v61 = vld [vmem:[%s3966_s1 + $0xba8] sm:$0xff]  ;;  %v419_v1 = vld [vmem:[%s3966_s1 + $0xba0] sm:$0xff]  ;;  %v386_v4 = vld [vmem:[%s3966_s1 + $0xa98] sm:$0xff] }
  0xbf   :  { %2083 = vmatpush3.msra.mxu0 %v374_v54  ;;  %2118 = vmatpush3.msra.mxu1 %v406_v55  ;;  %v372_v62 = vld [vmem:[%s3966_s1 + $0xa28] sm:$0xff]  ;;  %v371_v2 = vld [vmem:[%s3966_s1 + $0xa20] sm:$0xff]  ;;  %v418_v5 = vld [vmem:[%s3966_s1 + $0xb98] sm:$0xff] }
  0xc0   :  { %2084 = vmatprep.subr.mxu0 %v389_v56  ;;  %2119 = vmatprep.subr.mxu1 %v421_v57  ;;  %v404_v63 = vld [vmem:[%s3966_s1 + $0xb28] sm:$0xff]  ;;  %v403_v3 = vld [vmem:[%s3966_s1 + $0xb20] sm:$0xff]  ;;  %v370_v6 = vld [vmem:[%s3966_s1 + $0xa18] sm:$0xff] }
  0xc1   :  { %2085 = vmatpush3.msra.mxu0 %v373_v58  ;;  %2120 = vmatpush3.msra.mxu1 %v405_v59  ;;  %v402_v7 = vld [vmem:[%s3966_s1 + $0xb18] sm:$0xff]  ;;  %v385_v8 = vld [vmem:[%s3966_s1 + $0xa90] sm:$0xff]  ;;  %v384_v12 = vld [vmem:[%s3966_s1 + $0xa88] sm:$0xff] }
  0xc2   :  { %2086 = vmatprep.subr.mxu0 %v388_v60  ;;  %2121 = vmatprep.subr.mxu1 %v420_v61  ;;  %v417_v9 = vld [vmem:[%s3966_s1 + $0xb90] sm:$0xff]  ;;  %v416_v13 = vld [vmem:[%s3966_s1 + $0xb88] sm:$0xff]  ;;  %v383_v16 = vld [vmem:[%s3966_s1 + $0xa80] sm:$0xff] }
  0xc3   :  { %2087 = vmatpush3.msra.mxu0 %v372_v62  ;;  %2122 = vmatpush3.msra.mxu1 %v404_v63  ;;  %v369_v10 = vld [vmem:[%s3966_s1 + $0xa10] sm:$0xff]  ;;  %v368_v14 = vld [vmem:[%s3966_s1 + $0xa08] sm:$0xff]  ;;  %v415_v17 = vld [vmem:[%s3966_s1 + $0xb80] sm:$0xff] }
  0xc4   :  { %2088 = vmatprep.subr.mxu0 %v387_v0  ;;  %2123 = vmatprep.subr.mxu1 %v419_v1  ;;  %v401_v11 = vld [vmem:[%s3966_s1 + $0xb10] sm:$0xff]  ;;  %v400_v15 = vld [vmem:[%s3966_s1 + $0xb08] sm:$0xff]  ;;  %v367_v18 = vld [vmem:[%s3966_s1 + $0xa00] sm:$0xff] }
  0xc5   :  { %2089 = vmatpush3.msra.mxu0 %v371_v2  ;;  %2124 = vmatpush3.msra.mxu1 %v403_v3  ;;  %v36_v19 = vld [vmem:[%s3965_s0 + $0xa8] sm:$0xff]  ;;  %v399_v20 = vld [vmem:[%s3966_s1 + $0xb00] sm:$0xff]  ;;  %v38_v22 = vld [vmem:[%s3965_s0 + $0xb8] sm:$0xff] }
  0xc6   :  { %2090 = vmatprep.subr.mxu0 %v386_v4  ;;  %2125 = vmatprep.subr.mxu1 %v418_v5  ;;  %v35_v21 = vld [vmem:[%s3965_s0 + $0xa0] sm:$0xff]  ;;  %v462_v23 = vld [vmem:[%s3966_s1 + $0xcf8] sm:$0xff]  ;;  %v37_v25 = vld [vmem:[%s3965_s0 + $0xb0] sm:$0xff] }
  0xc7   :  { %2091 = vmatpush3.msra.mxu0 %v370_v6  ;;  %2126 = vmatpush3.msra.mxu1 %v402_v7  ;;  %v494_v24 = vld [vmem:[%s3966_s1 + $0xdf8] sm:$0xff]  ;;  %v461_v28 = vld [vmem:[%s3966_s1 + $0xcf0] sm:$0xff]  ;;  %v460_v32 = vld [vmem:[%s3966_s1 + $0xce8] sm:$0xff] }
  0xc8   :  { %2092 = vmatprep.subr.mxu0 %v385_v8  ;;  %2127 = vmatprep.subr.mxu1 %v417_v9  ;;  %v446_v26 = vld [vmem:[%s3966_s1 + $0xc78] sm:$0xff]  ;;  %v493_v29 = vld [vmem:[%s3966_s1 + $0xdf0] sm:$0xff]  ;;  %v492_v33 = vld [vmem:[%s3966_s1 + $0xde8] sm:$0xff] }
  0xc9   :  { %2093 = vmatpush3.msra.mxu0 %v369_v10  ;;  %2128 = vmatpush3.msra.mxu1 %v401_v11  ;;  %v478_v27 = vld [vmem:[%s3966_s1 + $0xd78] sm:$0xff]  ;;  %v445_v30 = vld [vmem:[%s3966_s1 + $0xc70] sm:$0xff]  ;;  %v444_v34 = vld [vmem:[%s3966_s1 + $0xc68] sm:$0xff] }
  0xca   :  { %2094 = vmatprep.subr.mxu0 %v384_v12  ;;  %2129 = vmatprep.subr.mxu1 %v416_v13  ;;  %v477_v31 = vld [vmem:[%s3966_s1 + $0xd70] sm:$0xff]  ;;  %v476_v35 = vld [vmem:[%s3966_s1 + $0xd68] sm:$0xff]  ;;  %v459_v36 = vld [vmem:[%s3966_s1 + $0xce0] sm:$0xff] }
  0xcb   :  { %2095 = vmatpush3.msra.mxu0 %v368_v14  ;;  %2130 = vmatpush3.msra.mxu1 %v400_v15  ;;  %v491_v37 = vld [vmem:[%s3966_s1 + $0xde0] sm:$0xff]  ;;  %v458_v40 = vld [vmem:[%s3966_s1 + $0xcd8] sm:$0xff]  ;;  %v457_v44 = vld [vmem:[%s3966_s1 + $0xcd0] sm:$0xff] }
  0xcc   :  { %2096 = vmatprep.subr.mxu0 %v383_v16  ;;  %2131 = vmatprep.subr.mxu1 %v415_v17  ;;  %v443_v38 = vld [vmem:[%s3966_s1 + $0xc60] sm:$0xff]  ;;  %v490_v41 = vld [vmem:[%s3966_s1 + $0xdd8] sm:$0xff]  ;;  %v489_v45 = vld [vmem:[%s3966_s1 + $0xdd0] sm:$0xff] }
  0xcd   :  { %2097 = vmatpush3.msra.mxu0 %v367_v18  ;;  %1330 = vmatprep.mubr.f32.mxu0 %v36_v19  ;;  %v475_v39 = vld [vmem:[%s3966_s1 + $0xd60] sm:$0xff]  ;;  %v442_v42 = vld [vmem:[%s3966_s1 + $0xc58] sm:$0xff]  ;;  %v441_v46 = vld [vmem:[%s3966_s1 + $0xc50] sm:$0xff] }
  0xce   :  { %2132 = vmatpush3.msra.mxu1 %v399_v20  ;;  %1331 = vmatmul.mubr.f32.vlgmr.msra.gmra.mxu0 %v35_v21  ;;  %v474_v43 = vld [vmem:[%s3966_s1 + $0xd58] sm:$0xff]  ;;  %v473_v47 = vld [vmem:[%s3966_s1 + $0xd50] sm:$0xff]  ;;  %v456_v48 = vld [vmem:[%s3966_s1 + $0xcc8] sm:$0xff] }
  0xcf   :  { %1400 = vmatprep.mubr.f32.mxu1 %v38_v22  ;;  %2136 = vmatprep.subr.mxu0 %v462_v23  ;;  %v488_v49 = vld [vmem:[%s3966_s1 + $0xdc8] sm:$0xff]  ;;  %v455_v52 = vld [vmem:[%s3966_s1 + $0xcc0] sm:$0xff]  ;;  %v454_v56 = vld [vmem:[%s3966_s1 + $0xcb8] sm:$0xff] }
  0xd0   :  { %2171 = vmatprep.subr.mxu1 %v494_v24  ;;  %1401 = vmatmul.mubr.f32.vlgmr.msra.gmra.mxu1 %v37_v25  ;;  %v440_v50 = vld [vmem:[%s3966_s1 + $0xc48] sm:$0xff]  ;;  %v487_v53 = vld [vmem:[%s3966_s1 + $0xdc0] sm:$0xff]  ;;  %v486_v57 = vld [vmem:[%s3966_s1 + $0xdb8] sm:$0xff] }
  0xd1   :  { %2137 = vmatpush3.msra.mxu0 %v446_v26  ;;  %2172 = vmatpush3.msra.mxu1 %v478_v27  ;;  %v472_v51 = vld [vmem:[%s3966_s1 + $0xd48] sm:$0xff]  ;;  %v439_v54 = vld [vmem:[%s3966_s1 + $0xc40] sm:$0xff]  ;;  %v438_v58 = vld [vmem:[%s3966_s1 + $0xc38] sm:$0xff] }
  0xd2   :  { %2138 = vmatprep.subr.mxu0 %v461_v28  ;;  %2173 = vmatprep.subr.mxu1 %v493_v29  ;;  %v471_v55 = vld [vmem:[%s3966_s1 + $0xd40] sm:$0xff]  ;;  %v470_v59 = vld [vmem:[%s3966_s1 + $0xd38] sm:$0xff]  ;;  %v453_v60 = vld [vmem:[%s3966_s1 + $0xcb0] sm:$0xff] }
  0xd3   :  { %2139 = vmatpush3.msra.mxu0 %v445_v30  ;;  %2174 = vmatpush3.msra.mxu1 %v477_v31  ;;  %v485_v61 = vld [vmem:[%s3966_s1 + $0xdb0] sm:$0xff]  ;;  %v452_v0 = vld [vmem:[%s3966_s1 + $0xca8] sm:$0xff]  ;;  %v451_v4 = vld [vmem:[%s3966_s1 + $0xca0] sm:$0xff] }
  0xd4   :  { %2140 = vmatprep.subr.mxu0 %v460_v32  ;;  %2175 = vmatprep.subr.mxu1 %v492_v33  ;;  %v437_v62 = vld [vmem:[%s3966_s1 + $0xc30] sm:$0xff]  ;;  %v484_v1 = vld [vmem:[%s3966_s1 + $0xda8] sm:$0xff]  ;;  %v483_v5 = vld [vmem:[%s3966_s1 + $0xda0] sm:$0xff] }
  0xd5   :  { %2141 = vmatpush3.msra.mxu0 %v444_v34  ;;  %2176 = vmatpush3.msra.mxu1 %v476_v35  ;;  %v469_v63 = vld [vmem:[%s3966_s1 + $0xd30] sm:$0xff]  ;;  %v436_v2 = vld [vmem:[%s3966_s1 + $0xc28] sm:$0xff]  ;;  %v435_v6 = vld [vmem:[%s3966_s1 + $0xc20] sm:$0xff] }
  0xd6   :  { %2142 = vmatprep.subr.mxu0 %v459_v36  ;;  %2177 = vmatprep.subr.mxu1 %v491_v37  ;;  %v468_v3 = vld [vmem:[%s3966_s1 + $0xd28] sm:$0xff]  ;;  %v467_v7 = vld [vmem:[%s3966_s1 + $0xd20] sm:$0xff]  ;;  %v450_v8 = vld [vmem:[%s3966_s1 + $0xc98] sm:$0xff] }
  0xd7   :  { %2143 = vmatpush3.msra.mxu0 %v443_v38  ;;  %2178 = vmatpush3.msra.mxu1 %v475_v39  ;;  %v482_v9 = vld [vmem:[%s3966_s1 + $0xd98] sm:$0xff]  ;;  %v449_v12 = vld [vmem:[%s3966_s1 + $0xc90] sm:$0xff]  ;;  %v448_v16 = vld [vmem:[%s3966_s1 + $0xc88] sm:$0xff] }
  0xd8   :  { %2144 = vmatprep.subr.mxu0 %v458_v40  ;;  %2179 = vmatprep.subr.mxu1 %v490_v41  ;;  %v434_v10 = vld [vmem:[%s3966_s1 + $0xc18] sm:$0xff]  ;;  %v481_v13 = vld [vmem:[%s3966_s1 + $0xd90] sm:$0xff]  ;;  %v480_v17 = vld [vmem:[%s3966_s1 + $0xd88] sm:$0xff] }
  0xd9   :  { %2145 = vmatpush3.msra.mxu0 %v442_v42  ;;  %2180 = vmatpush3.msra.mxu1 %v474_v43  ;;  %v466_v11 = vld [vmem:[%s3966_s1 + $0xd18] sm:$0xff]  ;;  %v433_v14 = vld [vmem:[%s3966_s1 + $0xc10] sm:$0xff]  ;;  %v432_v18 = vld [vmem:[%s3966_s1 + $0xc08] sm:$0xff] }
  0xda   :  { %2146 = vmatprep.subr.mxu0 %v457_v44  ;;  %2181 = vmatprep.subr.mxu1 %v489_v45  ;;  %v465_v15 = vld [vmem:[%s3966_s1 + $0xd10] sm:$0xff]  ;;  %v464_v19 = vld [vmem:[%s3966_s1 + $0xd08] sm:$0xff]  ;;  %v447_v20 = vld [vmem:[%s3966_s1 + $0xc80] sm:$0xff] }
  0xdb   :  { %2147 = vmatpush3.msra.mxu0 %v441_v46  ;;  %2182 = vmatpush3.msra.mxu1 %v473_v47  ;;  %v479_v21 = vld [vmem:[%s3966_s1 + $0xd80] sm:$0xff]  ;;  %v40_v23 = vld [vmem:[%s3965_s0 + $0xc8] sm:$0xff]  ;;  %v42_v26 = vld [vmem:[%s3965_s0 + $0xd8] sm:$0xff] }
  0xdc   :  { %2148 = vmatprep.subr.mxu0 %v456_v48  ;;  %2183 = vmatprep.subr.mxu1 %v488_v49  ;;  %v431_v22 = vld [vmem:[%s3966_s1 + $0xc00] sm:$0xff]  ;;  %v526_v27 = vld [vmem:[%s3966_s1 + $0xef8] sm:$0xff]  ;;  %v41_v29 = vld [vmem:[%s3965_s0 + $0xd0] sm:$0xff] }
  0xdd   :  { %2149 = vmatpush3.msra.mxu0 %v440_v50  ;;  %2184 = vmatpush3.msra.mxu1 %v472_v51  ;;  %v463_v24 = vld [vmem:[%s3966_s1 + $0xd00] sm:$0xff]  ;;  %v558_v28 = vld [vmem:[%s3966_s1 + $0xff8] sm:$0xff]  ;;  %v525_v32 = vld [vmem:[%s3966_s1 + $0xef0] sm:$0xff] }
  0xde   :  { %2150 = vmatprep.subr.mxu0 %v455_v52  ;;  %2185 = vmatprep.subr.mxu1 %v487_v53  ;;  %v39_v25 = vld [vmem:[%s3965_s0 + $0xc0] sm:$0xff]  ;;  %v510_v30 = vld [vmem:[%s3966_s1 + $0xe78] sm:$0xff]  ;;  %v557_v33 = vld [vmem:[%s3966_s1 + $0xff0] sm:$0xff] }
  0xdf   :  { %2151 = vmatpush3.msra.mxu0 %v439_v54  ;;  %2186 = vmatpush3.msra.mxu1 %v471_v55  ;;  %v542_v31 = vld [vmem:[%s3966_s1 + $0xf78] sm:$0xff]  ;;  %v509_v34 = vld [vmem:[%s3966_s1 + $0xe70] sm:$0xff]  ;;  %v524_v36 = vld [vmem:[%s3966_s1 + $0xee8] sm:$0xff] }
  0xe0   :  { %2152 = vmatprep.subr.mxu0 %v454_v56  ;;  %2187 = vmatprep.subr.mxu1 %v486_v57  ;;  %v541_v35 = vld [vmem:[%s3966_s1 + $0xf70] sm:$0xff]  ;;  %v556_v37 = vld [vmem:[%s3966_s1 + $0xfe8] sm:$0xff]  ;;  %v523_v40 = vld [vmem:[%s3966_s1 + $0xee0] sm:$0xff] }
  0xe1   :  { %2153 = vmatpush3.msra.mxu0 %v438_v58  ;;  %2188 = vmatpush3.msra.mxu1 %v470_v59  ;;  %v508_v38 = vld [vmem:[%s3966_s1 + $0xe68] sm:$0xff]  ;;  %v555_v41 = vld [vmem:[%s3966_s1 + $0xfe0] sm:$0xff]  ;;  %v522_v44 = vld [vmem:[%s3966_s1 + $0xed8] sm:$0xff] }
  0xe2   :  { %2154 = vmatprep.subr.mxu0 %v453_v60  ;;  %2189 = vmatprep.subr.mxu1 %v485_v61  ;;  %v540_v39 = vld [vmem:[%s3966_s1 + $0xf68] sm:$0xff]  ;;  %v507_v42 = vld [vmem:[%s3966_s1 + $0xe60] sm:$0xff]  ;;  %v554_v45 = vld [vmem:[%s3966_s1 + $0xfd8] sm:$0xff] }
  0xe3   :  { %2155 = vmatpush3.msra.mxu0 %v437_v62  ;;  %2190 = vmatpush3.msra.mxu1 %v469_v63  ;;  %v539_v43 = vld [vmem:[%s3966_s1 + $0xf60] sm:$0xff]  ;;  %v506_v46 = vld [vmem:[%s3966_s1 + $0xe58] sm:$0xff]  ;;  %v521_v48 = vld [vmem:[%s3966_s1 + $0xed0] sm:$0xff] }
  0xe4   :  { %2156 = vmatprep.subr.mxu0 %v452_v0  ;;  %2191 = vmatprep.subr.mxu1 %v484_v1  ;;  %v538_v47 = vld [vmem:[%s3966_s1 + $0xf58] sm:$0xff]  ;;  %v553_v49 = vld [vmem:[%s3966_s1 + $0xfd0] sm:$0xff]  ;;  %v520_v52 = vld [vmem:[%s3966_s1 + $0xec8] sm:$0xff] }
  0xe5   :  { %2157 = vmatpush3.msra.mxu0 %v436_v2  ;;  %2192 = vmatpush3.msra.mxu1 %v468_v3  ;;  %v505_v50 = vld [vmem:[%s3966_s1 + $0xe50] sm:$0xff]  ;;  %v552_v53 = vld [vmem:[%s3966_s1 + $0xfc8] sm:$0xff]  ;;  %v519_v56 = vld [vmem:[%s3966_s1 + $0xec0] sm:$0xff] }
  0xe6   :  { %2158 = vmatprep.subr.mxu0 %v451_v4  ;;  %2193 = vmatprep.subr.mxu1 %v483_v5  ;;  %v537_v51 = vld [vmem:[%s3966_s1 + $0xf50] sm:$0xff]  ;;  %v504_v54 = vld [vmem:[%s3966_s1 + $0xe48] sm:$0xff]  ;;  %v551_v57 = vld [vmem:[%s3966_s1 + $0xfc0] sm:$0xff] }
  0xe7   :  { %2159 = vmatpush3.msra.mxu0 %v435_v6  ;;  %2194 = vmatpush3.msra.mxu1 %v467_v7  ;;  %v536_v55 = vld [vmem:[%s3966_s1 + $0xf48] sm:$0xff]  ;;  %v503_v58 = vld [vmem:[%s3966_s1 + $0xe40] sm:$0xff]  ;;  %v518_v60 = vld [vmem:[%s3966_s1 + $0xeb8] sm:$0xff] }
  0xe8   :  { %2160 = vmatprep.subr.mxu0 %v450_v8  ;;  %2195 = vmatprep.subr.mxu1 %v482_v9  ;;  %v535_v59 = vld [vmem:[%s3966_s1 + $0xf40] sm:$0xff]  ;;  %v550_v61 = vld [vmem:[%s3966_s1 + $0xfb8] sm:$0xff]  ;;  %v517_v0 = vld [vmem:[%s3966_s1 + $0xeb0] sm:$0xff] }
  0xe9   :  { %2161 = vmatpush3.msra.mxu0 %v434_v10  ;;  %2196 = vmatpush3.msra.mxu1 %v466_v11  ;;  %v502_v62 = vld [vmem:[%s3966_s1 + $0xe38] sm:$0xff]  ;;  %v549_v1 = vld [vmem:[%s3966_s1 + $0xfb0] sm:$0xff]  ;;  %v516_v4 = vld [vmem:[%s3966_s1 + $0xea8] sm:$0xff] }
  0xea   :  { %2162 = vmatprep.subr.mxu0 %v449_v12  ;;  %2197 = vmatprep.subr.mxu1 %v481_v13  ;;  %v534_v63 = vld [vmem:[%s3966_s1 + $0xf38] sm:$0xff]  ;;  %v501_v2 = vld [vmem:[%s3966_s1 + $0xe30] sm:$0xff]  ;;  %v548_v5 = vld [vmem:[%s3966_s1 + $0xfa8] sm:$0xff] }
  0xeb   :  { %2163 = vmatpush3.msra.mxu0 %v433_v14  ;;  %2198 = vmatpush3.msra.mxu1 %v465_v15  ;;  %v533_v3 = vld [vmem:[%s3966_s1 + $0xf30] sm:$0xff]  ;;  %v500_v6 = vld [vmem:[%s3966_s1 + $0xe28] sm:$0xff]  ;;  %v515_v8 = vld [vmem:[%s3966_s1 + $0xea0] sm:$0xff] }
  0xec   :  { %2164 = vmatprep.subr.mxu0 %v448_v16  ;;  %2199 = vmatprep.subr.mxu1 %v480_v17  ;;  %v532_v7 = vld [vmem:[%s3966_s1 + $0xf28] sm:$0xff]  ;;  %v547_v9 = vld [vmem:[%s3966_s1 + $0xfa0] sm:$0xff]  ;;  %v514_v12 = vld [vmem:[%s3966_s1 + $0xe98] sm:$0xff] }
  0xed   :  { %2165 = vmatpush3.msra.mxu0 %v432_v18  ;;  %2200 = vmatpush3.msra.mxu1 %v464_v19  ;;  %v499_v10 = vld [vmem:[%s3966_s1 + $0xe20] sm:$0xff]  ;;  %v546_v13 = vld [vmem:[%s3966_s1 + $0xf98] sm:$0xff]  ;;  %v513_v16 = vld [vmem:[%s3966_s1 + $0xe90] sm:$0xff] }
  0xee   :  { %2166 = vmatprep.subr.mxu0 %v447_v20  ;;  %2201 = vmatprep.subr.mxu1 %v479_v21  ;;  %v531_v11 = vld [vmem:[%s3966_s1 + $0xf20] sm:$0xff]  ;;  %v498_v14 = vld [vmem:[%s3966_s1 + $0xe18] sm:$0xff]  ;;  %v545_v17 = vld [vmem:[%s3966_s1 + $0xf90] sm:$0xff] }
  0xef   :  { %2167 = vmatpush3.msra.mxu0 %v431_v22  ;;  %1470 = vmatprep.mubr.f32.mxu0 %v40_v23  ;;  %v530_v15 = vld [vmem:[%s3966_s1 + $0xf18] sm:$0xff]  ;;  %v497_v18 = vld [vmem:[%s3966_s1 + $0xe10] sm:$0xff]  ;;  %v512_v20 = vld [vmem:[%s3966_s1 + $0xe88] sm:$0xff] }
  0xf0   :  { %2202 = vmatpush3.msra.mxu1 %v463_v24  ;;  %1471 = vmatmul.mubr.f32.vlgmr.msra.gmra.mxu0 %v39_v25  ;;  %v529_v19 = vld [vmem:[%s3966_s1 + $0xf10] sm:$0xff]  ;;  %v544_v21 = vld [vmem:[%s3966_s1 + $0xf88] sm:$0xff]  ;;  %v511_v24 = vld [vmem:[%s3966_s1 + $0xe80] sm:$0xff] }
  0xf1   :  { %1540 = vmatprep.mubr.f32.mxu1 %v42_v26  ;;  %2206 = vmatprep.subr.mxu0 %v526_v27  ;;  %v496_v22 = vld [vmem:[%s3966_s1 + $0xe08] sm:$0xff]  ;;  %v543_v25 = vld [vmem:[%s3966_s1 + $0xf80] sm:$0xff] }
  0xf2   :  { %2241 = vmatprep.subr.mxu1 %v558_v28  ;;  %1541 = vmatmul.mubr.f32.vlgmr.msra.gmra.mxu1 %v41_v29  ;;  %v528_v23 = vld [vmem:[%s3966_s1 + $0xf08] sm:$0xff]  ;;  %v495_v26 = vld [vmem:[%s3966_s1 + $0xe00] sm:$0xff]  ;;  %v46_v29 = vld [vmem:[%s3965_s0 + $0xf8] sm:$0xff] }
  0xf3   :  { %2207 = vmatpush3.msra.mxu0 %v510_v30  ;;  %2242 = vmatpush3.msra.mxu1 %v542_v31  ;;  %v44_v27 = vld [vmem:[%s3965_s0 + $0xe8] sm:$0xff]  ;;  %v527_v28 = vld [vmem:[%s3966_s1 + $0xf00] sm:$0xff]  ;;  %v45_v31 = vld [vmem:[%s3965_s0 + $0xf0] sm:$0xff] }
  0xf4   :  { %2208 = vmatprep.subr.mxu0 %v525_v32  ;;  %2243 = vmatprep.subr.mxu1 %v557_v33  ;;  %v43_v30 = vld [vmem:[%s3965_s0 + $0xe0] sm:$0xff]  ;;  %v1748_v32 = vpop.f32.mrf.mxu0  ;;  %v1783_v33 = vpop.f32.mrf.mxu1  ;;  %s2303_s0 = smov [#allocation2]  }
  0xf5   :  { %2209 = vmatpush3.msra.mxu0 %v509_v34  ;;  %2244 = vmatpush3.msra.mxu1 %v541_v35 }
  0xf6   :  { %2210 = vmatprep.subr.mxu0 %v524_v36  ;;  %2245 = vmatprep.subr.mxu1 %v556_v37  ;;  %v1749_v34 = vpop.f32.mrf.mxu0  ;;  %v1715_v37 = vld [vmem:[%s3967_s2] ss:$0 sm:$0xff]  ;;  %s1707_s2 = sshll.u32 %s2303_s0, 4  ;;  %s1708_s2 = int_to_ptr.vmem [resolvable:$true] %s1707_s2 }
  0xf7   :  { %2211 = vmatpush3.msra.mxu0 %v508_v38  ;;  %2246 = vmatpush3.msra.mxu1 %v540_v39  ;;  %v1750_v36 = vadd.f32 %v1749_v34, %v1748_v32  ;;  %v1784_v38 = vpop.f32.mrf.mxu1  ;;  %s2281_s21 = scalar_lea.vmem %s1708_s2, 128  ;;  %p2286_p1 = scmp.lt.s32.totalorder %s1708_s2, %s1708_s2 }
  0xf8   :  { %2212 = vmatprep.subr.mxu0 %v523_v40  ;;  %2247 = vmatprep.subr.mxu1 %v555_v41  ;;  %p2282_p0 = scmp.ne.s32.totalorder %s1708_s2, %s2281_s21  ;;  %p2287_p2 = scmp.lt.s32.totalorder %s2281_s21, %s2281_s21 }
  0xf9   :  { %2213 = vmatpush3.msra.mxu0 %v507_v42  ;;  %2248 = vmatpush3.msra.mxu1 %v539_v43  ;;  %v633_v41 = vadd.f32 %v1750_v36, %v1715_v37  ;;  %v1785_v42 = vadd.f32 %v1784_v38, %v1783_v33 }
  0xfa   :  { %2214 = vmatprep.subr.mxu0 %v522_v44  ;;  %2249 = vmatprep.subr.mxu1 %v554_v45  ;;  %p2288_p3 = por %p2287_p2, %p2286_p1 }
  0xfb   :  { %2215 = vmatpush3.msra.mxu0 %v506_v46  ;;  %2250 = vmatpush3.msra.mxu1 %v538_v47  ;;  %v703_v46 = vadd.f32 %v1785_v42, %v633_v41 }
  0xfc   :  { %2216 = vmatprep.subr.mxu0 %v521_v48  ;;  %2251 = vmatprep.subr.mxu1 %v553_v49  ;;  %p2289_p4 = pnand %p2288_p3, %p2282_p0 }
  0xfd   :  { %2217 = vmatpush3.msra.mxu0 %v505_v50  ;;  %2252 = vmatpush3.msra.mxu1 %v537_v51 }
  0xfe   :  { %2218 = vmatprep.subr.mxu0 %v520_v52  ;;  %2253 = vmatprep.subr.mxu1 %v552_v53 }
  0xff   :  { %2219 = vmatpush3.msra.mxu0 %v504_v54  ;;  %2254 = vmatpush3.msra.mxu1 %v536_v55 }
 0x100   :  { %2220 = vmatprep.subr.mxu0 %v519_v56  ;;  %2255 = vmatprep.subr.mxu1 %v551_v57 }
 0x101   :  { %2221 = vmatpush3.msra.mxu0 %v503_v58  ;;  %2256 = vmatpush3.msra.mxu1 %v535_v59 }
 0x102   :  { %2222 = vmatprep.subr.mxu0 %v518_v60  ;;  %2257 = vmatprep.subr.mxu1 %v550_v61 }
 0x103   :  { %2223 = vmatpush3.msra.mxu0 %v502_v62  ;;  %2258 = vmatpush3.msra.mxu1 %v534_v63 }
 0x104   :  { %2224 = vmatprep.subr.mxu0 %v517_v0  ;;  %2259 = vmatprep.subr.mxu1 %v549_v1 }
 0x105   :  { %2225 = vmatpush3.msra.mxu0 %v501_v2  ;;  %2260 = vmatpush3.msra.mxu1 %v533_v3 }
 0x106   :  { %2226 = vmatprep.subr.mxu0 %v516_v4  ;;  %2261 = vmatprep.subr.mxu1 %v548_v5  ;;  %v1818_v35 = vpop.f32.mrf.mxu0 }
 0x107   :  { %2227 = vmatpush3.msra.mxu0 %v500_v6  ;;  %2262 = vmatpush3.msra.mxu1 %v532_v7 }
 0x108   :  { %2228 = vmatprep.subr.mxu0 %v515_v8  ;;  %2263 = vmatprep.subr.mxu1 %v547_v9  ;;  %v1853_v39 = vpop.f32.mrf.mxu1  ;;  %v1819_v40 = vpop.f32.mrf.mxu0 }
 0x109   :  { %2229 = vmatpush3.msra.mxu0 %v499_v10  ;;  %2264 = vmatpush3.msra.mxu1 %v531_v11  ;;  %v1820_v44 = vadd.f32 %v1819_v40, %v1818_v35 }
 0x10a   :  { %2230 = vmatprep.subr.mxu0 %v514_v12  ;;  %2265 = vmatprep.subr.mxu1 %v546_v13  ;;  %v1854_v45 = vpop.f32.mrf.mxu1 }
 0x10b   :  { %2231 = vmatpush3.msra.mxu0 %v498_v14  ;;  %2266 = vmatpush3.msra.mxu1 %v530_v15  ;;  %v773_v49 = vadd.f32 %v1820_v44, %v703_v46  ;;  %v1855_v50 = vadd.f32 %v1854_v45, %v1853_v39 }
 0x10c   :  { %2232 = vmatprep.subr.mxu0 %v513_v16  ;;  %2267 = vmatprep.subr.mxu1 %v545_v17 }
 0x10d   :  { %2233 = vmatpush3.msra.mxu0 %v497_v18  ;;  %2268 = vmatpush3.msra.mxu1 %v529_v19  ;;  %v843_v54 = vadd.f32 %v1855_v50, %v773_v49 }
 0x10e   :  { %2234 = vmatprep.subr.mxu0 %v512_v20  ;;  %2269 = vmatprep.subr.mxu1 %v544_v21 }
 0x10f   :  { %2235 = vmatpush3.msra.mxu0 %v496_v22  ;;  %2270 = vmatpush3.msra.mxu1 %v528_v23 }
 0x110   :  { %2236 = vmatprep.subr.mxu0 %v511_v24  ;;  %2271 = vmatprep.subr.mxu1 %v543_v25 }
 0x111   :  { %2237 = vmatpush3.msra.mxu0 %v495_v26  ;;  %1610 = vmatprep.mubr.f32.mxu0 %v44_v27 }
 0x112   :  { %2272 = vmatpush3.msra.mxu1 %v527_v28  ;;  %1680 = vmatprep.mubr.f32.mxu1 %v46_v29 }
 0x113   :  { %1611 = vmatmul.mubr.f32.vlgmr.msra.gmra.mxu0 %v43_v30  ;;  %1681 = vmatmul.mubr.f32.vlgmr.msra.gmra.mxu1 %v45_v31 }
 0x128   :  { %v1888_v43 = vpop.f32.mrf.mxu0 }
 0x12a   :  { %v1923_v47 = vpop.f32.mrf.mxu1  ;;  %v1889_v48 = vpop.f32.mrf.mxu0 }
 0x12b   :  { %v1890_v52 = vadd.f32 %v1889_v48, %v1888_v43 }
 0x12c   :  { %v1924_v53 = vpop.f32.mrf.mxu1 }
 0x12d   :  { %v913_v57 = vadd.f32 %v1890_v52, %v843_v54  ;;  %v1925_v58 = vadd.f32 %v1924_v53, %v1923_v47 }
 0x12f   :  { %v983_v62 = vadd.f32 %v1925_v58, %v913_v57 }
 0x14a   :  { %v1958_v51 = vpop.f32.mrf.mxu0 }
 0x14c   :  { %v1993_v55 = vpop.f32.mrf.mxu1  ;;  %v1959_v56 = vpop.f32.mrf.mxu0 }
 0x14d   :  { %v1960_v60 = vadd.f32 %v1959_v56, %v1958_v51 }
 0x14e   :  { %v1994_v61 = vpop.f32.mrf.mxu1 }
 0x14f   :  { %v1053_v1 = vadd.f32 %v1960_v60, %v983_v62  ;;  %v1995_v2 = vadd.f32 %v1994_v61, %v1993_v55 }
 0x151   :  { %v1123_v6 = vadd.f32 %v1995_v2, %v1053_v1 }
 0x16c   :  { %v2028_v59 = vpop.f32.mrf.mxu0 }
 0x16e   :  { %v2063_v63 = vpop.f32.mrf.mxu1  ;;  %v2029_v0 = vpop.f32.mrf.mxu0 }
 0x16f   :  { %v2030_v4 = vadd.f32 %v2029_v0, %v2028_v59 }
 0x170   :  { %v2064_v5 = vpop.f32.mrf.mxu1 }
 0x171   :  { %v1193_v9 = vadd.f32 %v2030_v4, %v1123_v6  ;;  %v2065_v10 = vadd.f32 %v2064_v5, %v2063_v63 }
 0x173   :  { %v1263_v14 = vadd.f32 %v2065_v10, %v1193_v9 }
 0x18e   :  { %v2098_v3 = vpop.f32.mrf.mxu0 }
 0x190   :  { %v2133_v7 = vpop.f32.mrf.mxu1  ;;  %v2099_v8 = vpop.f32.mrf.mxu0 }
 0x191   :  { %v2100_v12 = vadd.f32 %v2099_v8, %v2098_v3 }
 0x192   :  { %v2134_v13 = vpop.f32.mrf.mxu1 }
 0x193   :  { %v1333_v17 = vadd.f32 %v2100_v12, %v1263_v14  ;;  %v2135_v18 = vadd.f32 %v2134_v13, %v2133_v7 }
 0x195   :  { %v1403_v21 = vadd.f32 %v2135_v18, %v1333_v17 }
 0x1b0   :  { %v2168_v11 = vpop.f32.mrf.mxu0 }
 0x1b2   :  { %v2203_v15 = vpop.f32.mrf.mxu1  ;;  %v2169_v16 = vpop.f32.mrf.mxu0 }
 0x1b3   :  { %v2170_v19 = vadd.f32 %v2169_v16, %v2168_v11 }
 0x1b4   :  { %v2204_v20 = vpop.f32.mrf.mxu1 }
 0x1b5   :  { %v1473_v22 = vadd.f32 %v2170_v19, %v1403_v21  ;;  %v2205_v23 = vadd.f32 %v2204_v20, %v2203_v15 }
 0x1b7   :  { %v1543_v28 = vadd.f32 %v2205_v23, %v1473_v22 }
 0x1d3   :  { %v2238_v24 = vpop.f32.mrf.mxu0  ;;  %v2273_v25 = vpop.f32.mrf.mxu1 }
 0x1d5   :  { %v2239_v26 = vpop.f32.mrf.mxu0  ;;  %v2274_v27 = vpop.f32.mrf.mxu1 }
 0x1d6   :  { %v2240_v29 = vadd.f32 %v2239_v26, %v2238_v24  ;;  %v2275_v31 = vadd.f32 %v2274_v27, %v2273_v25 }
 0x1d8   :  { %v1613_v30 = vadd.f32 %v2240_v29, %v1543_v28 }
 0x1da   :  { %v1683_v32 = vadd.f32 %v2275_v31, %v1613_v30 }
 0x1dc   :  { %v1687_v33 = vsel %vm1686_vm0, %v1683_v32, -inf }
 0x1dd   :  { %1688 = vmax.xlane.f32.xlu0 %v1687_v33 }
 0x266   :  { %v1689_v34 = vpop.xlane.xlu0 %1688 }
 0x267   :  { %v1690_v35 = vsub.f32 %v1683_v32, %v1689_v34 }
 0x269   :  { %v1691_v36 = vmul.f32 1.442695, %v1690_v35 }
 0x26b   :  { %2277 = vpow2.f32 %v1691_v36 }
 0x278   :  { %v2278_v37 = vpop.eup %2277 }
 0x279   :  { %v1693_v38 = vsel %vm1686_vm0, %v2278_v37, 0.0 }
 0x27a   :  { %1694 = vadd.xlane.f32.xlu0 %v1693_v38 }
 0x303   :  { %v1695_v39 = vpop.xlane.xlu0 %1694 }
 0x304   :  { %2279 = vlog2.f32 %v1695_v39 }
 0x311   :  { %v2280_v40 = vpop.eup %2279 }
 0x312   :  { %v1697_v41 = vmul.f32 0.6931472, %v2280_v40 }
 0x314   :  { %v1698_v42 = vadd.f32 %v1697_v41, %v1689_v34 }
 0x316   :  { %v1699_v43 = vsub.f32 %v1683_v32, %v1698_v42 }
 0x318   :  { %1700 = vst.msk [vmem:[#allocation2] sm:$0xff] %vm1686_vm0, %v1699_v43 }
 0x319   :  { %2292 = shalt.err (!%p2289_p4)
}
 0x31a   :  { %1710 = dma.vmem_to_hbm [thread:$0]  %s1708_s2, 128, %s3968_s3, [#allocation3]  }
 0x31b   :  { %2301 = dma.done.wait [#allocation3], 128  }
 0x31c   :  { %2302 = vsyncadd [#allocation3], 4294967168 }
 0x31d   :  { %1714 = vsyncpa [#allocation3], 1 }

</bundles_post_ra>
